<compile_context>
chip_gen: v5e
topology: v5e:2x2
jax: 0.10.0
libtpu: 0.0.40
codegen_flags: <defaults>
</compile_context>

<pallas_src>
import functools
import random

import numpy as np
import jax
import jax.numpy as jnp
from jax.experimental import pallas as pl
from jax.experimental.pallas import tpu as pltpu


# ------------------------- fused Pallas kernel -------------------------

def _cell_kernel(coef_ref, x_ref, w_ref, b_ref, adjc_ref, o_ref, ystack_ref, *,
                 plan, id_plan, n_nodes, num_real, eps, use_norm, use_nl):
    """Whole Cell.forward in one invocation.

    coef_ref   : SMEM f32 [n_step*n_step*num_adjs]   folded mixing coefficients
    x_ref      : VMEM f32 [N, n_hid_prev]
    w_ref      : VMEM f32 [n_hid_prev, n_hid]
    b_ref      : VMEM f32 [1, n_hid]
    adjc_ref   : VMEM dot_dtype [N, num_real*N]  non-identity adjs, lane-concat
    o_ref      : VMEM f32 [N, n_hid]
    ystack_ref : VMEM scratch dot_dtype [num_real*N, n_hid]
    plan[t][a] : static tuple of (source_state_j, flat_coef_index) for real adj a
    id_plan[t] : static tuple of (source_state_j, flat_coef_index) for identity
    """
    d = w_ref.shape[1]
    dot_dtype = ystack_ref.dtype
    n_targets = len(plan)

    # state 0: affine projection (MXU) + bias broadcast; stays on-chip.
    states = [jnp.dot(x_ref[...], w_ref[...],
                      preferred_element_type=jnp.float32) + b_ref[...]]

    # statically tracked scratch-slice contents: garbage / zero / data
    slice_state = ["garbage"] * num_real

    for t in range(n_targets):
        # Build the stacked RHS Y[num_real*N, n_hid] for this target.
        for a in range(num_real):
            srcs = plan[t][a]
            lo = a * n_nodes
            if srcs:
                y = None
                for (j, fi) in srcs:          # cheap VPU scalar*state AXPYs
                    term = coef_ref[fi] * states[j]
                    y = term if y is None else y + term
                ystack_ref[pl.ds(lo, n_nodes), :] = y.astype(dot_dtype)
                slice_state[a] = "data"
            elif slice_state[a] != "zero":    # statically known dead slice
                ystack_ref[pl.ds(lo, n_nodes), :] = jnp.zeros((n_nodes, d),
                                                              dot_dtype)
                slice_state[a] = "zero"

        # ONE MXU pass per DAG node: K = num_real * N.
        acc = jnp.dot(adjc_ref[...], ystack_ref[...],
                      preferred_element_type=jnp.float32)

        # identity / self-loop adjacency: plain VPU add, no MXU pass.
        for (j, fi) in id_plan[t]:
            acc = acc + coef_ref[fi] * states[j]

        if t < n_targets - 1:
            states.append(acc)                # intermediate DAG state (vregs)
        else:
            out = acc                         # epilogue: LayerNorm + exact GELU
            if use_norm:
                mean = jnp.mean(out, axis=-1, keepdims=True)
                var = jnp.mean(jnp.square(out - mean), axis=-1, keepdims=True)
                out = (out - mean) * jax.lax.rsqrt(var + eps)
            if use_nl:
                out = 0.5 * out * (1.0 + jax.lax.erf(
                    out * jnp.float32(0.7071067811865476)))
            o_ref[...] = out


def make_cell_forward(n, n_hid, num_real, plan, id_plan, use_norm, use_nl,
                      dot_dtype, eps=1e-5):
    """Build (once per static plan) the jitted fused forward."""
    kern = functools.partial(_cell_kernel, plan=plan, id_plan=id_plan,
                             n_nodes=n, num_real=num_real, eps=eps,
                             use_norm=use_norm, use_nl=use_nl)
    call = pl.pallas_call(
        kern,
        out_shape=jax.ShapeDtypeStruct((n, n_hid), jnp.float32),
        in_specs=[
            pl.BlockSpec(memory_space=pltpu.MemorySpace.SMEM),  # coefficients
            pl.BlockSpec(memory_space=pltpu.MemorySpace.VMEM),  # x
            pl.BlockSpec(memory_space=pltpu.MemorySpace.VMEM),  # w
            pl.BlockSpec(memory_space=pltpu.MemorySpace.VMEM),  # b
            pl.BlockSpec(memory_space=pltpu.MemorySpace.VMEM),  # adj concat
        ],
        out_specs=pl.BlockSpec(memory_space=pltpu.MemorySpace.VMEM),
        scratch_shapes=[pltpu.VMEM((num_real * n, n_hid), dot_dtype)],
    )

    def fwd(ws_parts, scatter, x, w, b, adj_concat):
        ws_flat = jnp.concatenate([p.reshape(-1).astype(jnp.float32)
                                   for p in ws_parts])
        coef = ws_flat @ scatter              # tiny dense ws -> coef fold
        return call(coef, x, w, b, adj_concat)

    return jax.jit(fwd)


# ------------------------- Cell wrapper (host glue) -------------------------

class PallasCell:
    """JAX/Pallas port of the PyTorch `Cell` module (fully fused forward)."""

    def __init__(self, n_step, n_hid_prev, n_hid, cstr, k,
                 use_norm=True, use_nl=True, ratio=1, seed=0,
                 dot_dtype=jnp.float32):
        self.n_step = int(n_step)
        self.n_hid = int(n_hid)
        self.cstr = list(cstr)
        self.k = int(k)
        self.use_norm = use_norm
        self.use_nl = use_nl
        self.ratio = float(ratio)
        self.dot_dtype = dot_dtype
        # deterministic nn.Linear(n_hid_prev, n_hid) parameters
        kw, kb = jax.random.split(jax.random.PRNGKey(seed))
        bound = 1.0 / float(n_hid_prev) ** 0.5
        self.w = jax.random.uniform(kw, (n_hid_prev, n_hid), jnp.float32,
                                    -bound, bound)
        self.b = jax.random.uniform(kb, (1, n_hid), jnp.float32, -bound, bound)
        # TODO(synk): the original Op draws a fresh random.sample per forward
        # call; here the sub-sample is drawn from a seeded host RNG when the
        # scatter matrix is (re)built (k=1 selects every op -> exact match).
        self._py_rng = random.Random(0)
        self._fwd_cache = {}
        self._adj_cache = None

    # ---- static architecture description (independent of ws values) ----
    def _static_ops(self, num_adjs):
        """[(flat_ws_offset, target, src, adj_idx_list, scale)], total_ws."""
        n_step, ratio, cstr = self.n_step, self.ratio, self.cstr
        ops, off = [], 0
        seq0_off = []
        for _ in range(n_step - 1):
            seq0_off.append(off); off += num_adjs - 1
        n_res0 = (n_step - 1) * (n_step - 2) // 2
        res0_off = []
        for _ in range(n_res0):
            res0_off.append(off); off += num_adjs
        seq1_off = off; off += len(cstr)
        res1_off = []
        for _ in range(n_step - 1):
            res1_off.append(off); off += len(cstr) + 1
        total_ws = off

        edge = 1.0
        offset = 0
        for i in range(n_step - 1):
            ops.append((seq0_off[i], i, i, list(range(num_adjs - 1)),
                        1.0 / edge))
            for j in range(i):
                ops.append((res0_off[offset + j], i, j, list(range(num_adjs)),
                            ratio / edge))
            offset += i
        last = n_step - 1
        ops.append((seq1_off, last, n_step - 1, list(cstr), 1.0 / edge))
        res_adj = list(cstr) + [num_adjs - 1]
        for i in range(n_step - 1):
            ops.append((res1_off[i], last, i, res_adj, ratio / edge))
        return ops, total_ws

    def _build_plan(self, num_adjs, last_is_identity):
        n_step = self.n_step
        num_real = num_adjs - 1 if last_is_identity else num_adjs
        ops, total_ws = self._static_ops(num_adjs)

        def flat(t, j, a):
            return (t * n_step + j) * num_adjs + a

        plan_lists = [[[] for _ in range(num_real)] for _ in range(n_step)]
        id_lists = [[] for _ in range(n_step)]
        seen = set()
        for (_woff, t, j, adj_list, _scale) in ops:
            for a in adj_list:
                if (t, j, a) in seen:
                    continue
                seen.add((t, j, a))
                if last_is_identity and a == num_adjs - 1:
                    id_lists[t].append((j, flat(t, j, a)))
                else:
                    plan_lists[t][a].append((j, flat(t, j, a)))
        plan = tuple(tuple(tuple(col) for col in row) for row in plan_lists)
        id_plan = tuple(tuple(row) for row in id_lists)
        coef_len = n_step * n_step * num_adjs
        return ops, total_ws, plan, id_plan, coef_len, num_real

    def _build_scatter(self, ops, total_ws, coef_len, num_adjs):
        """Dense [total_ws, coef_len] fold of ws -> coef (incl. 1/num & ratio)."""
        n_step = self.n_step

        def flat(t, j, a):
            return (t * n_step + j) * num_adjs + a

        S = np.zeros((total_ws, coef_len), np.float32)
        for (woff, t, j, adj_list, scale) in ops:
            num_op = len(adj_list)
            num = int(num_op // self.k)
            sel = self._py_rng.sample(range(num_op), num)
            for q in sel:
                S[woff + q, flat(t, j, adj_list[q])] += scale / num
        return jnp.asarray(S)

    def _prepare_adjs(self, adjs):
        cached = self._adj_cache
        if cached is not None and cached[0] is adjs:
            return cached[1], cached[2]
        n = adjs[0].shape[0]
        try:
            last_is_identity = bool(np.array_equal(
                np.asarray(adjs[-1], np.float32), np.eye(n, dtype=np.float32)))
        except Exception:        # traced adjacencies: keep the general path
            last_is_identity = False
        real = adjs[:-1] if last_is_identity else list(adjs)
        adj_concat = jnp.concatenate(
            [jnp.asarray(a, self.dot_dtype) for a in real], axis=1)
        self._adj_cache = (adjs, adj_concat, last_is_identity)
        return adj_concat, last_is_identity

    def __call__(self, x, adjs, ws_seq, ws_res):
        num_adjs = len(adjs)
        n = adjs[0].shape[0]
        adj_concat, last_is_identity = self._prepare_adjs(adjs)

        key = (num_adjs, last_is_identity, n)
        if key not in self._fwd_cache:
            ops, total_ws, plan, id_plan, coef_len, num_real = \
                self._build_plan(num_adjs, last_is_identity)
            fwd = make_cell_forward(n, self.n_hid, num_real, plan, id_plan,
                                    self.use_norm, self.use_nl, self.dot_dtype)
            scatter = (self._build_scatter(ops, total_ws, coef_len, num_adjs)
                       if self.k == 1 else None)   # k=1: static, build once
            self._fwd_cache[key] = (fwd, ops, total_ws, coef_len, scatter)
        fwd, ops, total_ws, coef_len, scatter = self._fwd_cache[key]
        if scatter is None:                        # k > 1: resample per call
            scatter = self._build_scatter(ops, total_ws, coef_len, num_adjs)

        n_res0 = (self.n_step - 1) * (self.n_step - 2) // 2
        parts = tuple([ws_seq[0][i] for i in range(self.n_step - 1)]
                      + [ws_res[0][r] for r in range(n_res0)]
                      + [ws_seq[1]]
                      + [ws_res[1][i] for i in range(self.n_step - 1)])
        return fwd(parts, scatter, x.astype(jnp.float32), self.w, self.b,
                   adj_concat)


# ------------------------- pure-JAX reference -------------------------

def _ref_op(x, adjs, ws, k):
    num_op = len(ws)
    num = num_op // k  # with k=1 the random subsample selects every op
    return sum(ws[i] * (adjs[i] @ x) for i in range(num_op)) / num


def ref_cell(x, adjs, ws_seq, ws_res, w, b, n_step, cstr, k, ratio,
             use_norm, use_nl):
    x = x @ w + b
    states = [x]
    offset = 0
    edge = 1
    for i in range(n_step - 1):
        seqi = _ref_op(states[i], adjs[:-1], ws_seq[0][i], k)
        resi = sum(_ref_op(h, adjs, ws_res[0][offset + j], k)
                   for j, h in enumerate(states[:i]))
        offset += i
        states.append((seqi + ratio * resi) / edge)
    adjs_cstr = [adjs[i] for i in cstr]
    out_seq = _ref_op(states[-1], adjs_cstr, ws_seq[1], k)
    adjs_cstr = adjs_cstr + [adjs[-1]]
    out_res = sum(_ref_op(h, adjs_cstr, ws_res[1][i], k)
                  for i, h in enumerate(states[:-1]))
    out = (out_seq + ratio * out_res) / edge
    if use_norm:
        mean = out.mean(-1, keepdims=True)
        var = ((out - mean) ** 2).mean(-1, keepdims=True)
        out = (out - mean) / jnp.sqrt(var + 1e-5)
    if use_nl:
        out = jax.nn.gelu(out, approximate=False)
    return out


# ------------------------- main -------------------------

if __name__ == "__main__":
    N = 64            # graph nodes
    n_hid_prev = 16
    n_hid = 32
    n_step = 3
    num_adjs = 4      # last adj is identity (self-loop), as in the original model
    cstr = [0, 2]
    k = 1             # k=1 => Op's random subsample selects all ops (deterministic)
    ratio = 1

    key = jax.random.PRNGKey(0)
    keys = jax.random.split(key, 8)
    x = jax.random.normal(keys[0], (N, n_hid_prev), jnp.float32)

    # dense stand-ins for the sparse adjacency matrices (row-normalized random graphs)
    adjs = []
    for a in range(num_adjs - 1):
        mask = (jax.random.uniform(keys[1 + a], (N, N)) < 0.1).astype(jnp.float32)
        deg = jnp.maximum(mask.sum(-1, keepdims=True), 1.0)
        adjs.append(mask / deg)
    adjs.append(jnp.eye(N, dtype=jnp.float32))

    # architecture mixing weights (shapes implied by Cell.forward)
    ws_seq = [
        [jax.nn.softmax(jax.random.normal(jax.random.fold_in(keys[5], i),
                                          (num_adjs - 1,))) for i in range(n_step - 1)],
        jax.nn.softmax(jax.random.normal(keys[6], (len(cstr),))),
    ]
    n_res0 = sum(i - 1 for i in range(2, n_step))  # == len(ops_res)
    ws_res = [
        [jax.nn.softmax(jax.random.normal(jax.random.fold_in(keys[7], j),
                                          (num_adjs,))) for j in range(n_res0)],
        [jax.nn.softmax(jax.random.normal(jax.random.fold_in(keys[7], 100 + j),
                                          (len(cstr) + 1,))) for j in range(n_step - 1)],
    ]

    cell = PallasCell(n_step, n_hid_prev, n_hid, cstr, k, ratio=ratio)
    out = jax.block_until_ready(cell(x, adjs, ws_seq, ws_res))

    ref = ref_cell(x, adjs, ws_seq, ws_res, cell.w, cell.b,
                   n_step, cstr, k, ratio, True, True)
    err = float(jnp.abs(out - ref).max())
    assert out.shape == (N, n_hid) and err < 5e-4, err
    print("KERNEL_OK")
</pallas_src>

<mosaic_0001>
module attributes {stable_mosaic.version = 11 : i64} {
  func.func @_cell_kernel(%arg0: memref<36xf32, #tpu.memory_space<smem>>, %arg1: memref<64x16xf32, #tpu.memory_space<vmem>>, %arg2: memref<16x32xf32, #tpu.memory_space<vmem>>, %arg3: memref<1x32xf32, #tpu.memory_space<vmem>>, %arg4: memref<64x192xf32, #tpu.memory_space<vmem>>, %arg5: memref<64x32xf32, #tpu.memory_space<vmem>>, %arg6: memref<192x32xf32, #tpu.memory_space<vmem>>) attributes {dimension_semantics = [], scalar_prefetch = 0 : i64, scratch_operands = 1 : i64, tpu.core_type = #tpu.core_type<tc>} {
    %c0 = arith.constant 0 : index
    %c0_0 = arith.constant 0 : index
    %0 = vector.load %arg1[%c0, %c0_0] : memref<64x16xf32, #tpu.memory_space<vmem>>, vector<64x16xf32>
    %c0_1 = arith.constant 0 : index
    %c0_2 = arith.constant 0 : index
    %1 = vector.load %arg2[%c0_1, %c0_2] : memref<16x32xf32, #tpu.memory_space<vmem>>, vector<16x32xf32>
    %cst = arith.constant dense<0.000000e+00> : vector<64x32xf32>
    %2 = tpu.matmul %0, %1, %cst {dimension_numbers = #tpu.dot_dimension_numbers<[1], [0], [0], [1], [0, 0, 1, 1], [], []>} : vector<64x16xf32>, vector<16x32xf32>, vector<64x32xf32> -> vector<64x32xf32>
    %c0_3 = arith.constant 0 : index
    %c0_4 = arith.constant 0 : index
    %3 = vector.load %arg3[%c0_3, %c0_4] : memref<1x32xf32, #tpu.memory_space<vmem>>, vector<1x32xf32>
    %4 = vector.broadcast %3 : vector<1x32xf32> to vector<64x32xf32>
    %5 = arith.addf %2, %4 : vector<64x32xf32>
    %c0_5 = arith.constant 0 : index
    %6 = memref.load %arg0[%c0_5] : memref<36xf32, #tpu.memory_space<smem>>
    %7 = vector.broadcast %6 : f32 to vector<64x32xf32>
    %8 = arith.mulf %7, %5 : vector<64x32xf32>
    %c0_6 = arith.constant 0 : index
    %c0_7 = arith.constant 0 : index
    %9 = vector.load %arg6[%c0_6, %c0_7] : memref<192x32xf32, #tpu.memory_space<vmem>>, vector<64x32xf32>
    tpu.vector_store %arg6[%c0_6, %c0_7], %8 {strides = array<i32>} : memref<192x32xf32, #tpu.memory_space<vmem>>, vector<64x32xf32>,
    %c1 = arith.constant 1 : index
    %10 = memref.load %arg0[%c1] : memref<36xf32, #tpu.memory_space<smem>>
    %11 = vector.broadcast %10 : f32 to vector<64x32xf32>
    %12 = arith.mulf %11, %5 : vector<64x32xf32>
    %c64 = arith.constant 64 : index
    %c0_8 = arith.constant 0 : index
    %13 = vector.load %arg6[%c64, %c0_8] : memref<192x32xf32, #tpu.memory_space<vmem>>, vector<64x32xf32>
    tpu.vector_store %arg6[%c64, %c0_8], %12 {strides = array<i32>} : memref<192x32xf32, #tpu.memory_space<vmem>>, vector<64x32xf32>,
    %c2 = arith.constant 2 : index
    %14 = memref.load %arg0[%c2] : memref<36xf32, #tpu.memory_space<smem>>
    %15 = vector.broadcast %14 : f32 to vector<64x32xf32>
    %16 = arith.mulf %15, %5 : vector<64x32xf32>
    %c128 = arith.constant 128 : index
    %c0_9 = arith.constant 0 : index
    %17 = vector.load %arg6[%c128, %c0_9] : memref<192x32xf32, #tpu.memory_space<vmem>>, vector<64x32xf32>
    tpu.vector_store %arg6[%c128, %c0_9], %16 {strides = array<i32>} : memref<192x32xf32, #tpu.memory_space<vmem>>, vector<64x32xf32>,
    %c0_10 = arith.constant 0 : index
    %c0_11 = arith.constant 0 : index
    %18 = vector.load %arg4[%c0_10, %c0_11] : memref<64x192xf32, #tpu.memory_space<vmem>>, vector<64x192xf32>
    %c0_12 = arith.constant 0 : index
    %c0_13 = arith.constant 0 : index
    %19 = vector.load %arg6[%c0_12, %c0_13] : memref<192x32xf32, #tpu.memory_space<vmem>>, vector<192x32xf32>
    %cst_14 = arith.constant dense<0.000000e+00> : vector<64x32xf32>
    %20 = tpu.matmul %18, %19, %cst_14 {dimension_numbers = #tpu.dot_dimension_numbers<[1], [0], [0], [1], [0, 0, 1, 1], [], []>} : vector<64x192xf32>, vector<192x32xf32>, vector<64x32xf32> -> vector<64x32xf32>
    %c16 = arith.constant 16 : index
    %21 = memref.load %arg0[%c16] : memref<36xf32, #tpu.memory_space<smem>>
    %22 = vector.broadcast %21 : f32 to vector<64x32xf32>
    %23 = arith.mulf %22, %20 : vector<64x32xf32>
    %c12 = arith.constant 12 : index
    %24 = memref.load %arg0[%c12] : memref<36xf32, #tpu.memory_space<smem>>
    %25 = vector.broadcast %24 : f32 to vector<64x32xf32>
    %26 = arith.mulf %25, %5 : vector<64x32xf32>
    %27 = arith.addf %23, %26 : vector<64x32xf32>
    %c0_15 = arith.constant 0 : index
    %c0_16 = arith.constant 0 : index
    %28 = vector.load %arg6[%c0_15, %c0_16] : memref<192x32xf32, #tpu.memory_space<vmem>>, vector<64x32xf32>
    tpu.vector_store %arg6[%c0_15, %c0_16], %27 {strides = array<i32>} : memref<192x32xf32, #tpu.memory_space<vmem>>, vector<64x32xf32>,
    %c17 = arith.constant 17 : index
    %29 = memref.load %arg0[%c17] : memref<36xf32, #tpu.memory_space<smem>>
    %30 = vector.broadcast %29 : f32 to vector<64x32xf32>
    %31 = arith.mulf %30, %20 : vector<64x32xf32>
    %c13 = arith.constant 13 : index
    %32 = memref.load %arg0[%c13] : memref<36xf32, #tpu.memory_space<smem>>
    %33 = vector.broadcast %32 : f32 to vector<64x32xf32>
    %34 = arith.mulf %33, %5 : vector<64x32xf32>
    %35 = arith.addf %31, %34 : vector<64x32xf32>
    %c64_17 = arith.constant 64 : index
    %c0_18 = arith.constant 0 : index
    %36 = vector.load %arg6[%c64_17, %c0_18] : memref<192x32xf32, #tpu.memory_space<vmem>>, vector<64x32xf32>
    tpu.vector_store %arg6[%c64_17, %c0_18], %35 {strides = array<i32>} : memref<192x32xf32, #tpu.memory_space<vmem>>, vector<64x32xf32>,
    %c18 = arith.constant 18 : index
    %37 = memref.load %arg0[%c18] : memref<36xf32, #tpu.memory_space<smem>>
    %38 = vector.broadcast %37 : f32 to vector<64x32xf32>
    %39 = arith.mulf %38, %20 : vector<64x32xf32>
    %c14 = arith.constant 14 : index
    %40 = memref.load %arg0[%c14] : memref<36xf32, #tpu.memory_space<smem>>
    %41 = vector.broadcast %40 : f32 to vector<64x32xf32>
    %42 = arith.mulf %41, %5 : vector<64x32xf32>
    %43 = arith.addf %39, %42 : vector<64x32xf32>
    %c128_19 = arith.constant 128 : index
    %c0_20 = arith.constant 0 : index
    %44 = vector.load %arg6[%c128_19, %c0_20] : memref<192x32xf32, #tpu.memory_space<vmem>>, vector<64x32xf32>
    tpu.vector_store %arg6[%c128_19, %c0_20], %43 {strides = array<i32>} : memref<192x32xf32, #tpu.memory_space<vmem>>, vector<64x32xf32>,
    %c0_21 = arith.constant 0 : index
    %c0_22 = arith.constant 0 : index
    %45 = vector.load %arg4[%c0_21, %c0_22] : memref<64x192xf32, #tpu.memory_space<vmem>>, vector<64x192xf32>
    %c0_23 = arith.constant 0 : index
    %c0_24 = arith.constant 0 : index
    %46 = vector.load %arg6[%c0_23, %c0_24] : memref<192x32xf32, #tpu.memory_space<vmem>>, vector<192x32xf32>
    %cst_25 = arith.constant dense<0.000000e+00> : vector<64x32xf32>
    %47 = tpu.matmul %45, %46, %cst_25 {dimension_numbers = #tpu.dot_dimension_numbers<[1], [0], [0], [1], [0, 0, 1, 1], [], []>} : vector<64x192xf32>, vector<192x32xf32>, vector<64x32xf32> -> vector<64x32xf32>
    %c15 = arith.constant 15 : index
    %48 = memref.load %arg0[%c15] : memref<36xf32, #tpu.memory_space<smem>>
    %49 = vector.broadcast %48 : f32 to vector<64x32xf32>
    %50 = arith.mulf %49, %5 : vector<64x32xf32>
    %51 = arith.addf %47, %50 : vector<64x32xf32>
    %c32 = arith.constant 32 : index
    %52 = memref.load %arg0[%c32] : memref<36xf32, #tpu.memory_space<smem>>
    %53 = vector.broadcast %52 : f32 to vector<64x32xf32>
    %54 = arith.mulf %53, %51 : vector<64x32xf32>
    %c24 = arith.constant 24 : index
    %55 = memref.load %arg0[%c24] : memref<36xf32, #tpu.memory_space<smem>>
    %56 = vector.broadcast %55 : f32 to vector<64x32xf32>
    %57 = arith.mulf %56, %5 : vector<64x32xf32>
    %58 = arith.addf %54, %57 : vector<64x32xf32>
    %c28 = arith.constant 28 : index
    %59 = memref.load %arg0[%c28] : memref<36xf32, #tpu.memory_space<smem>>
    %60 = vector.broadcast %59 : f32 to vector<64x32xf32>
    %61 = arith.mulf %60, %20 : vector<64x32xf32>
    %62 = arith.addf %58, %61 : vector<64x32xf32>
    %c0_26 = arith.constant 0 : index
    %c0_27 = arith.constant 0 : index
    %63 = vector.load %arg6[%c0_26, %c0_27] : memref<192x32xf32, #tpu.memory_space<vmem>>, vector<64x32xf32>
    tpu.vector_store %arg6[%c0_26, %c0_27], %62 {strides = array<i32>} : memref<192x32xf32, #tpu.memory_space<vmem>>, vector<64x32xf32>,
    %cst_28 = arith.constant 0.000000e+00 : f32
    %64 = vector.broadcast %cst_28 : f32 to vector<64x32xf32>
    %c64_29 = arith.constant 64 : index
    %c0_30 = arith.constant 0 : index
    %65 = vector.load %arg6[%c64_29, %c0_30] : memref<192x32xf32, #tpu.memory_space<vmem>>, vector<64x32xf32>
    tpu.vector_store %arg6[%c64_29, %c0_30], %64 {strides = array<i32>} : memref<192x32xf32, #tpu.memory_space<vmem>>, vector<64x32xf32>,
    %c34 = arith.constant 34 : index
    %66 = memref.load %arg0[%c34] : memref<36xf32, #tpu.memory_space<smem>>
    %67 = vector.broadcast %66 : f32 to vector<64x32xf32>
    %68 = arith.mulf %67, %51 : vector<64x32xf32>
    %c26 = arith.constant 26 : index
    %69 = memref.load %arg0[%c26] : memref<36xf32, #tpu.memory_space<smem>>
    %70 = vector.broadcast %69 : f32 to vector<64x32xf32>
    %71 = arith.mulf %70, %5 : vector<64x32xf32>
    %72 = arith.addf %68, %71 : vector<64x32xf32>
    %c30 = arith.constant 30 : index
    %73 = memref.load %arg0[%c30] : memref<36xf32, #tpu.memory_space<smem>>
    %74 = vector.broadcast %73 : f32 to vector<64x32xf32>
    %75 = arith.mulf %74, %20 : vector<64x32xf32>
    %76 = arith.addf %72, %75 : vector<64x32xf32>
    %c128_31 = arith.constant 128 : index
    %c0_32 = arith.constant 0 : index
    %77 = vector.load %arg6[%c128_31, %c0_32] : memref<192x32xf32, #tpu.memory_space<vmem>>, vector<64x32xf32>
    tpu.vector_store %arg6[%c128_31, %c0_32], %76 {strides = array<i32>} : memref<192x32xf32, #tpu.memory_space<vmem>>, vector<64x32xf32>,
    %c0_33 = arith.constant 0 : index
    %c0_34 = arith.constant 0 : index
    %78 = vector.load %arg4[%c0_33, %c0_34] : memref<64x192xf32, #tpu.memory_space<vmem>>, vector<64x192xf32>
    %c0_35 = arith.constant 0 : index
    %c0_36 = arith.constant 0 : index
    %79 = vector.load %arg6[%c0_35, %c0_36] : memref<192x32xf32, #tpu.memory_space<vmem>>, vector<192x32xf32>
    %cst_37 = arith.constant dense<0.000000e+00> : vector<64x32xf32>
    %80 = tpu.matmul %78, %79, %cst_37 {dimension_numbers = #tpu.dot_dimension_numbers<[1], [0], [0], [1], [0, 0, 1, 1], [], []>} : vector<64x192xf32>, vector<192x32xf32>, vector<64x32xf32> -> vector<64x32xf32>
    %c27 = arith.constant 27 : index
    %81 = memref.load %arg0[%c27] : memref<36xf32, #tpu.memory_space<smem>>
    %82 = vector.broadcast %81 : f32 to vector<64x32xf32>
    %83 = arith.mulf %82, %5 : vector<64x32xf32>
    %84 = arith.addf %80, %83 : vector<64x32xf32>
    %c31 = arith.constant 31 : index
    %85 = memref.load %arg0[%c31] : memref<36xf32, #tpu.memory_space<smem>>
    %86 = vector.broadcast %85 : f32 to vector<64x32xf32>
    %87 = arith.mulf %86, %20 : vector<64x32xf32>
    %88 = arith.addf %84, %87 : vector<64x32xf32>
    %cst_38 = arith.constant dense<0.000000e+00> : vector<64xf32>
    %89 = vector.multi_reduction <add>, %88, %cst_38 [1] : vector<64x32xf32> to vector<64xf32>
    %90 = vector.shape_cast %89 : vector<64xf32> to vector<64x1xf32>
    %cst_39 = arith.constant 3.200000e+01 : f32
    %91 = vector.broadcast %cst_39 : f32 to vector<64x1xf32>
    %92 = arith.divf %90, %91 : vector<64x1xf32>
    %93 = vector.broadcast %92 : vector<64x1xf32> to vector<64x32xf32>
    %94 = arith.subf %88, %93 : vector<64x32xf32>
    %95 = arith.mulf %94, %94 : vector<64x32xf32>
    %cst_40 = arith.constant dense<0.000000e+00> : vector<64xf32>
    %96 = vector.multi_reduction <add>, %95, %cst_40 [1] : vector<64x32xf32> to vector<64xf32>
    %97 = vector.shape_cast %96 : vector<64xf32> to vector<64x1xf32>
    %cst_41 = arith.constant 3.200000e+01 : f32
    %98 = vector.broadcast %cst_41 : f32 to vector<64x1xf32>
    %99 = arith.divf %97, %98 : vector<64x1xf32>
    %100 = vector.broadcast %92 : vector<64x1xf32> to vector<64x32xf32>
    %101 = arith.subf %88, %100 : vector<64x32xf32>
    %cst_42 = arith.constant 9.99999974E-6 : f32
    %102 = vector.broadcast %cst_42 : f32 to vector<64x1xf32>
    %103 = arith.addf %99, %102 : vector<64x1xf32>
    %104 = math.rsqrt %103 : vector<64x1xf32>
    %105 = vector.broadcast %104 : vector<64x1xf32> to vector<64x32xf32>
    %106 = arith.mulf %101, %105 : vector<64x32xf32>
    %cst_43 = arith.constant 5.000000e-01 : f32
    %107 = vector.broadcast %cst_43 : f32 to vector<64x32xf32>
    %108 = arith.mulf %107, %106 : vector<64x32xf32>
    %cst_44 = arith.constant 0.707106769 : f32
    %109 = vector.broadcast %cst_44 : f32 to vector<64x32xf32>
    %110 = arith.mulf %106, %109 : vector<64x32xf32>
    %111 = math.erf %110 : vector<64x32xf32>
    %cst_45 = arith.constant 1.000000e+00 : f32
    %112 = vector.broadcast %cst_45 : f32 to vector<64x32xf32>
    %113 = arith.addf %112, %111 : vector<64x32xf32>
    %114 = arith.mulf %108, %113 : vector<64x32xf32>
    %c0_46 = arith.constant 0 : index
    %c0_47 = arith.constant 0 : index
    %115 = vector.load %arg5[%c0_46, %c0_47] : memref<64x32xf32, #tpu.memory_space<vmem>>, vector<64x32xf32>
    tpu.vector_store %arg5[%c0_46, %c0_47], %114 {strides = array<i32>} : memref<64x32xf32, #tpu.memory_space<vmem>>, vector<64x32xf32>,
    return
  }
}

</mosaic_0001>

<bundles_post_ra>
// kernel: fwd.1
= control target key start
LH: loop header
LB: loop body
LE: loop exit
PB: predicated region body
PF: predicated region fallthrough
CT: control target
= control target key end

     0   :  { %10 = vsyncpa [#allocation5], 0  ;;  %s2560_s0 = inlined_call_operand.vmem [shape: f32[36], index: 0, kind: input, shape index: {}]   ;;  %s2561_s1 = inlined_call_operand.vmem [shape: f32[64,16], index: 1, kind: input, shape index: {}]   ;;  %s2562_s2 = inlined_call_operand.vmem [shape: f32[16,32], index: 2, kind: input, shape index: {}]   ;;  %s2563_s3 = inlined_call_operand.vmem [shape: f32[1,32], index: 3, kind: input, shape index: {}]   ;;  %s2564_s4 = inlined_call_operand.hbm [shape: f32[64,192], index: 4, kind: input, shape index: {}]   ;;  %s2565_s5 = inlined_call_operand.vmem [shape: f32[64,32], index: 5, kind: output, shape index: {}]  }
   0x1   :  { %s17_s20 = sshll.u32 %s2560_s0, 4  ;;  %s18_s20 = int_to_ptr.vmem [resolvable:$true] %s17_s20 }
   0x2   :  { %11 = vsyncpa [#allocation4], 0  ;;  %s31_s23 = sshll.u32 %s2564_s4, 4  ;;  %s1588_s24 = smov [#allocation3]   ;;  %s32_s23 = int_to_ptr.hbm [resolvable:$true] %s31_s23 }
   0x3   :  { %20 = dma.vmem_to_smem %s18_s20, 16, %s1588_s24, [#allocation5]  }
   0x4   :  { %s1589_s25 = smov [#allocation6]   ;;  %s1590_s27 = smov 256  }
   0x5   :  { %s33_s26 = sshll.u32 %s1589_s25, 4  ;;  %s1591_s28 = smov 16   ;;  %s34_s26 = int_to_ptr.vmem [resolvable:$true] %s33_s26 }
   0x6   :  { %39 = dma.hbm_to_vmem [thread:$0]  %s32_s23, 2048, %s34_s26, [#allocation4], %s1590_s27, %s1590_s27, %s1591_s28  }
   0x7   :  { %1584 = dma.done.wait [#allocation5], 16  }
   0x8   :  { %1585 = vsyncadd [#allocation5], 4294967280 }
   0x9   :  { %1586 = dma.done.wait [#allocation4], 2048  }
   0xa   :  { %1587 = vsyncadd [#allocation4], 4294965248 }
   0xb   :  { %48 = sfence }
   0xc   :  { %v58_v0 = vld [vmem:[%s2562_s2 + $0x8] sm:$0xff]  ;;  %v57_v1 = vld [vmem:[%s2562_s2] sm:$0xff]  ;;  %vm63_vm0 = vcmask 130048   ;;  %v51_v4 = vld [vmem:[%s2561_s1 + $0x10] sm:$0xff]  ;;  %s1442_s21 = sld [smem:[#allocation3 + $0x1]]  ;;  %vm139_vm1 = vcmask 261120  }
   0xd   :  { %102 = vmatpush.msra.mxu0 %v58_v0  ;;  %v49_v2 = vld [vmem:[%s2561_s1] sm:$0xff]  ;;  %v50_v3 = vld [vmem:[%s2561_s1 + $0x8] sm:$0xff]  ;;  %v52_v5 = vld [vmem:[%s2561_s1 + $0x18] sm:$0xff]  ;;  %s1443_s22 = sld [smem:[#allocation3 + $0x2]]  ;;  %vm224_vm2 = vcmask 523264  }
   0xe   :  { %v53_v6 = vld [vmem:[%s2561_s1 + $0x20] sm:$0xff]  ;;  %v54_v7 = vld [vmem:[%s2561_s1 + $0x28] sm:$0xff]  ;;  %v55_v8 = vld [vmem:[%s2561_s1 + $0x30] sm:$0xff]  ;;  %s129_s23 = sld [smem:[#allocation3]] }
   0xf   :  { %103 = vmatpush.msra.mxu0 %v57_v1  ;;  %v56_v9 = vld [vmem:[%s2561_s1 + $0x38] sm:$0xff]  ;;  %v1513_v10 = vld [vmem:[%s2563_s3] ss:$0 sm:$0xff]  ;;  %s1453_s1 = sld [smem:[#allocation3 + $0xc]] }
  0x10   :  { %1434 = vmatmul.msk.f32.vlgmr.msra.gmra.mxu0 %vm63_vm0, %v49_v2  ;;  %s1457_s3 = sld [smem:[#allocation3 + $0xe]] }
  0x11   :  { %s1455_s26 = sld [smem:[#allocation3 + $0xd]] }
  0x12   :  { %v149_v12 = vstv %s1442_s21  ;;  %s1452_s27 = sld [smem:[#allocation3 + $0x10]] }
  0x13   :  { %v167_v13 = vstv %s1443_s22  ;;  %s1456_s28 = sld [smem:[#allocation3 + $0x12]] }
  0x14   :  { %v130_v14 = vstv %s129_s23  ;;  %s1454_s0 = sld [smem:[#allocation3 + $0x11]] }
  0x15   :  { %s1458_s29 = sld [smem:[#allocation3 + $0xf]] }
  0x16   :  { %s1468_s30 = sld [smem:[#allocation3 + $0x18]] }
  0x17   :  { %s1471_s4 = sld [smem:[#allocation3 + $0x1a]] }
  0x18   :  { %1435 = vmatmul.msk.f32.gmra.mxu0 %vm63_vm0, %v50_v3  ;;  %s1467_s6 = sld [smem:[#allocation3 + $0x20]] }
  0x19   :  { %s1470_s7 = sld [smem:[#allocation3 + $0x22]] }
  0x1a   :  { %s1469_s8 = sld [smem:[#allocation3 + $0x1c]] }
  0x1b   :  { %s1472_s9 = sld [smem:[#allocation3 + $0x1e]] }
  0x1c   :  { %s1473_s10 = sld [smem:[#allocation3 + $0x1b]] }
  0x1d   :  { %s1482_s11 = sld [smem:[#allocation3 + $0x1f]] }
  0x20   :  { %1436 = vmatmul.msk.f32.gmra.mxu0 %vm63_vm0, %v51_v4 }
  0x28   :  { %1437 = vmatmul.msk.f32.gmra.mxu0 %vm63_vm0, %v52_v5  ;;  %v1735_v5 = vld [vmem:[#allocation6 + $0x8] sm:$0xff] }
  0x30   :  { %1438 = vmatmul.msk.f32.gmra.mxu0 %vm63_vm0, %v53_v6 }
  0x38   :  { %1439 = vmatmul.msk.f32.gmra.mxu0 %vm63_vm0, %v54_v7 }
  0x40   :  { %1440 = vmatmul.msk.f32.gmra.mxu0 %vm63_vm0, %v55_v8 }
  0x48   :  { %1441 = vmatmul.msk.f32.gmra.mxu0 %vm63_vm0, %v56_v9 }
  0x8d   :  { %v105_v11 = vpop.f32.mrf.mxu0 }
  0x8e   :  { %v1671_v15 = vadd.f32 %v1513_v10, %v105_v11  ;;  %v1739_v11 = vld [vmem:[#allocation6 + $0x18] sm:$0xff] }
  0x90   :  { %v150_v16 = vmul.f32 %v149_v12, %v1671_v15  ;;  %v168_v17 = vmul.f32 %v167_v13, %v1671_v15  ;;  %v131_v18 = vmul.f32 %v130_v14, %v1671_v15 }
  0x92   :  { %158 = vst.msk [vmem:[#allocation2 + $0x40] sm:$0xff] %vm139_vm1, %v150_v16 }
  0x93   :  { %176 = vst.msk [vmem:[#allocation2 + $0x80] sm:$0xff] %vm139_vm1, %v168_v17  ;;  %v1747_v17 = vld [vmem:[#allocation6] sm:$0xff] }
  0x94   :  { %140 = vst.msk [vmem:[#allocation2] sm:$0xff] %vm139_vm1, %v131_v18 }
  0x95   :  { %v108_v19 = vpop.f32.mrf.mxu0 }
  0x96   :  { %v1679_v20 = vadd.f32 %v1513_v10, %v108_v19  ;;  %v1749_v19 = vld [vmem:[#allocation6 + $0x28] sm:$0xff] }
  0x98   :  { %v151_v21 = vmul.f32 %v149_v12, %v1679_v20  ;;  %v169_v22 = vmul.f32 %v167_v13, %v1679_v20  ;;  %v132_v23 = vmul.f32 %v130_v14, %v1679_v20 }
  0x99   :  { %v208_v4 = vld [vmem:[#allocation2 + $0x40] sm:$0xff] }
  0x9a   :  { %159 = vst.msk [vmem:[#allocation2 + $0x48] sm:$0xff] %vm139_vm1, %v151_v21  ;;  %v216_v6 = vld [vmem:[#allocation2 + $0x80] sm:$0xff]  ;;  %v1752_v21 = vld [vmem:[#allocation6 + $0x58] sm:$0xff] }
  0x9b   :  { %177 = vst.msk [vmem:[#allocation2 + $0x88] sm:$0xff] %vm139_vm1, %v169_v22  ;;  %v200_v18 = vld [vmem:[#allocation2] sm:$0xff]  ;;  %v1758_v22 = vld [vmem:[#allocation6 + $0x10] sm:$0xff] }
  0x9c   :  { %141 = vst.msk [vmem:[#allocation2 + $0x8] sm:$0xff] %vm139_vm1, %v132_v23  ;;  %v1760_v23 = vld [vmem:[#allocation6 + $0x38] sm:$0xff] }
  0x9d   :  { %v111_v24 = vpop.f32.mrf.mxu0 }
  0x9e   :  { %v1687_v25 = vadd.f32 %v1513_v10, %v111_v24  ;;  %v1763_v24 = vld [vmem:[#allocation6 + $0x68] sm:$0xff] }
  0xa0   :  { %v152_v26 = vmul.f32 %v149_v12, %v1687_v25  ;;  %v170_v27 = vmul.f32 %v167_v13, %v1687_v25  ;;  %v133_v28 = vmul.f32 %v130_v14, %v1687_v25 }
  0xa1   :  { %v209_v2 = vld [vmem:[#allocation2 + $0x48] sm:$0xff] }
  0xa2   :  { %160 = vst.msk [vmem:[#allocation2 + $0x50] sm:$0xff] %vm139_vm1, %v152_v26  ;;  %v217_v3 = vld [vmem:[#allocation2 + $0x88] sm:$0xff]  ;;  %v1769_v26 = vld [vmem:[#allocation6 + $0x20] sm:$0xff] }
  0xa3   :  { %178 = vst.msk [vmem:[#allocation2 + $0x90] sm:$0xff] %vm139_vm1, %v170_v27  ;;  %v201_v16 = vld [vmem:[#allocation2 + $0x8] sm:$0xff]  ;;  %v1772_v27 = vld [vmem:[#allocation6 + $0x78] sm:$0xff] }
  0xa4   :  { %142 = vst.msk [vmem:[#allocation2 + $0x10] sm:$0xff] %vm139_vm1, %v133_v28  ;;  %v1776_v28 = vld [vmem:[#allocation6 + $0x30] sm:$0xff] }
  0xa5   :  { %v114_v29 = vpop.f32.mrf.mxu0 }
  0xa6   :  { %v1695_v30 = vadd.f32 %v1513_v10, %v114_v29  ;;  %v1779_v29 = vld [vmem:[#allocation6 + $0x40] sm:$0xff] }
  0xa8   :  { %v153_v31 = vmul.f32 %v149_v12, %v1695_v30  ;;  %v171_v32 = vmul.f32 %v167_v13, %v1695_v30  ;;  %v134_v33 = vmul.f32 %v130_v14, %v1695_v30 }
  0xa9   :  { %v210_v0 = vld [vmem:[#allocation2 + $0x50] sm:$0xff] }
  0xaa   :  { %161 = vst.msk [vmem:[#allocation2 + $0x58] sm:$0xff] %vm139_vm1, %v153_v31  ;;  %v218_v1 = vld [vmem:[#allocation2 + $0x90] sm:$0xff] }
  0xab   :  { %179 = vst.msk [vmem:[#allocation2 + $0x98] sm:$0xff] %vm139_vm1, %v171_v32  ;;  %v1782_v31 = vld [vmem:[#allocation6 + $0x50] sm:$0xff]  ;;  %v1785_v32 = vld [vmem:[#allocation6 + $0x60] sm:$0xff] }
  0xac   :  { %143 = vst.msk [vmem:[#allocation2 + $0x18] sm:$0xff] %vm139_vm1, %v134_v33  ;;  %v1788_v33 = vld [vmem:[#allocation6 + $0x70] sm:$0xff] }
  0xad   :  { %v117_v34 = vpop.f32.mrf.mxu0 }
  0xae   :  { %v1703_v35 = vadd.f32 %v1513_v10, %v117_v34 }
  0xb0   :  { %v154_v36 = vmul.f32 %v149_v12, %v1703_v35  ;;  %v172_v37 = vmul.f32 %v167_v13, %v1703_v35  ;;  %v135_v38 = vmul.f32 %v130_v14, %v1703_v35 }
  0xb1   :  { %v211_v62 = vld [vmem:[#allocation2 + $0x58] sm:$0xff] }
  0xb2   :  { %162 = vst.msk [vmem:[#allocation2 + $0x60] sm:$0xff] %vm139_vm1, %v154_v36  ;;  %v219_v63 = vld [vmem:[#allocation2 + $0x98] sm:$0xff]  ;;  %v1791_v36 = vstv %s1453_s1 }
  0xb3   :  { %180 = vst.msk [vmem:[#allocation2 + $0xa0] sm:$0xff] %vm139_vm1, %v172_v37  ;;  %v1793_v37 = vstv %s1457_s3 }
  0xb4   :  { %144 = vst.msk [vmem:[#allocation2 + $0x20] sm:$0xff] %vm139_vm1, %v135_v38 }
  0xb5   :  { %v120_v39 = vpop.f32.mrf.mxu0 }
  0xb6   :  { %v1711_v40 = vadd.f32 %v1513_v10, %v120_v39  ;;  %v1795_v39 = vstv %s1452_s27 }
  0xb8   :  { %v155_v41 = vmul.f32 %v149_v12, %v1711_v40  ;;  %v173_v42 = vmul.f32 %v167_v13, %v1711_v40  ;;  %v136_v43 = vmul.f32 %v130_v14, %v1711_v40 }
  0xb9   :  { %v212_v60 = vld [vmem:[#allocation2 + $0x60] sm:$0xff] }
  0xba   :  { %163 = vst.msk [vmem:[#allocation2 + $0x68] sm:$0xff] %vm139_vm1, %v155_v41  ;;  %v220_v61 = vld [vmem:[#allocation2 + $0xa0] sm:$0xff]  ;;  %v1797_v41 = vstv %s1456_s28 }
  0xbb   :  { %181 = vst.msk [vmem:[#allocation2 + $0xa8] sm:$0xff] %vm139_vm1, %v173_v42  ;;  %v1799_v42 = vstv %s1454_s0 }
  0xbc   :  { %145 = vst.msk [vmem:[#allocation2 + $0x28] sm:$0xff] %vm139_vm1, %v136_v43  ;;  %v1801_v43 = vstv %s1455_s26 }
  0xbd   :  { %v123_v44 = vpop.f32.mrf.mxu0 }
  0xbe   :  { %v1719_v45 = vadd.f32 %v1513_v10, %v123_v44 }
  0xc0   :  { %v156_v46 = vmul.f32 %v149_v12, %v1719_v45  ;;  %v174_v47 = vmul.f32 %v167_v13, %v1719_v45  ;;  %v137_v48 = vmul.f32 %v130_v14, %v1719_v45 }
  0xc1   :  { %v213_v58 = vld [vmem:[#allocation2 + $0x68] sm:$0xff] }
  0xc2   :  { %164 = vst.msk [vmem:[#allocation2 + $0x70] sm:$0xff] %vm139_vm1, %v156_v46  ;;  %v221_v59 = vld [vmem:[#allocation2 + $0xa8] sm:$0xff]  ;;  %v343_v46 = vmul.f32 %v1791_v36, %v1671_v15 }
  0xc3   :  { %182 = vst.msk [vmem:[#allocation2 + $0xb0] sm:$0xff] %vm139_vm1, %v174_v47  ;;  %v205_v9 = vld [vmem:[#allocation2 + $0x28] sm:$0xff]  ;;  %v415_v47 = vmul.f32 %v1793_v37, %v1671_v15 }
  0xc4   :  { %146 = vst.msk [vmem:[#allocation2 + $0x30] sm:$0xff] %vm139_vm1, %v137_v48 }
  0xc5   :  { %v126_v49 = vpop.f32.mrf.mxu0 }
  0xc6   :  { %v1727_v50 = vadd.f32 %v1513_v10, %v126_v49  ;;  %v204_v10 = vld [vmem:[#allocation2 + $0x20] sm:$0xff] }
  0xc8   :  { %v157_v51 = vmul.f32 %v149_v12, %v1727_v50  ;;  %v175_v52 = vmul.f32 %v167_v13, %v1727_v50  ;;  %v138_v53 = vmul.f32 %v130_v14, %v1727_v50  ;;  %v203_v12 = vld [vmem:[#allocation2 + $0x18] sm:$0xff]  ;;  %v1741_v13 = vld [vmem:[#allocation6 + $0x48] sm:$0xff]  ;;  %v202_v14 = vld [vmem:[#allocation2 + $0x10] sm:$0xff] }
  0xc9   :  { %v214_v56 = vld [vmem:[#allocation2 + $0x70] sm:$0xff] }
  0xca   :  { %165 = vst.msk [vmem:[#allocation2 + $0x78] sm:$0xff] %vm139_vm1, %v157_v51  ;;  %v222_v57 = vld [vmem:[#allocation2 + $0xb0] sm:$0xff] }
  0xcb   :  { %183 = vst.msk [vmem:[#allocation2 + $0xb8] sm:$0xff] %vm139_vm1, %v175_v52  ;;  %v206_v8 = vld [vmem:[#allocation2 + $0x30] sm:$0xff] }
  0xcc   :  { %147 = vst.msk [vmem:[#allocation2 + $0x38] sm:$0xff] %vm139_vm1, %v138_v53  ;;  %v379_v53 = vmul.f32 %v1801_v43, %v1671_v15 }
  0xd1   :  { %v215_v54 = vld [vmem:[#allocation2 + $0x78] sm:$0xff] }
  0xd2   :  { %249 = vmatpush.msra.mxu1 %v215_v54  ;;  %v223_v55 = vld [vmem:[#allocation2 + $0xb8] sm:$0xff] }
  0xd3   :  { %298 = vmatpush.msra.mxu2 %v223_v55  ;;  %1491 = vmatpush.msra.mxu3 %v223_v55  ;;  %v207_v7 = vld [vmem:[#allocation2 + $0x38] sm:$0xff] }
  0xd4   :  { %250 = vmatpush.msra.mxu1 %v214_v56 }
  0xd5   :  { %299 = vmatpush.msra.mxu2 %v222_v57  ;;  %1492 = vmatpush.msra.mxu3 %v222_v57 }
  0xd6   :  { %251 = vmatpush.msra.mxu1 %v213_v58 }
  0xd7   :  { %300 = vmatpush.msra.mxu2 %v221_v59  ;;  %1493 = vmatpush.msra.mxu3 %v221_v59  ;;  %v344_v59 = vmul.f32 %v1791_v36, %v1679_v20 }
  0xd8   :  { %252 = vmatpush.msra.mxu1 %v212_v60  ;;  %v416_v60 = vmul.f32 %v1793_v37, %v1679_v20 }
  0xd9   :  { %301 = vmatpush.msra.mxu2 %v220_v61  ;;  %1494 = vmatpush.msra.mxu3 %v220_v61 }
  0xda   :  { %253 = vmatpush.msra.mxu1 %v211_v62 }
  0xdb   :  { %302 = vmatpush.msra.mxu2 %v219_v63  ;;  %1495 = vmatpush.msra.mxu3 %v219_v63 }
  0xdc   :  { %254 = vmatpush.msra.mxu1 %v210_v0  ;;  %v380_v0 = vmul.f32 %v1801_v43, %v1679_v20 }
  0xdd   :  { %303 = vmatpush.msra.mxu2 %v218_v1  ;;  %1496 = vmatpush.msra.mxu3 %v218_v1 }
  0xde   :  { %255 = vmatpush.msra.mxu1 %v209_v2 }
  0xdf   :  { %304 = vmatpush.msra.mxu2 %v217_v3  ;;  %1497 = vmatpush.msra.mxu3 %v217_v3 }
  0xe0   :  { %256 = vmatpush.msra.mxu1 %v208_v4 }
  0xe1   :  { %305 = vmatpush.msra.mxu2 %v216_v6  ;;  %1498 = vmatpush.msra.mxu3 %v216_v6 }
  0xe2   :  { %257 = vmatpush.msra.mxu1 %v207_v7  ;;  %1444 = vmatmul.msk.f32.vlgmr.msra.gmra.mxu2 %vm224_vm2, %v1735_v5 }
  0xe3   :  { %1448 = vmatmul.msk.f32.vlgmr.msra.gmra.mxu3 %vm224_vm2, %v1741_v13 }
  0xe4   :  { %258 = vmatpush.msra.mxu1 %v206_v8  ;;  %v345_v8 = vmul.f32 %v1791_v36, %v1687_v25 }
  0xe6   :  { %259 = vmatpush.msra.mxu1 %v205_v9  ;;  %v417_v9 = vmul.f32 %v1793_v37, %v1687_v25 }
  0xe8   :  { %260 = vmatpush.msra.mxu1 %v204_v10 }
  0xea   :  { %261 = vmatpush.msra.mxu1 %v203_v12  ;;  %1445 = vmatmul.msk.f32.gmra.mxu2 %vm224_vm2, %v1739_v11 }
  0xeb   :  { %1449 = vmatmul.msk.f32.gmra.mxu3 %vm224_vm2, %v1752_v21 }
  0xec   :  { %262 = vmatpush.msra.mxu1 %v202_v14 }
  0xee   :  { %263 = vmatpush.msra.mxu1 %v201_v16  ;;  %v381_v16 = vmul.f32 %v1801_v43, %v1687_v25 }
  0xf0   :  { %264 = vmatpush.msra.mxu1 %v200_v18 }
  0xf1   :  { %265 = vmatmul.f32.vlgmr.msra.gmra.mxu1 %v1747_v17 }
  0xf2   :  { %1446 = vmatmul.msk.f32.gmra.mxu2 %vm224_vm2, %v1749_v19 }
  0xf3   :  { %1450 = vmatmul.msk.f32.gmra.mxu3 %vm224_vm2, %v1763_v24 }
  0xf9   :  { %268 = vmatmul.f32.gmra.mxu1 %v1758_v22 }
  0xfa   :  { %1447 = vmatmul.msk.f32.gmra.mxu2 %vm224_vm2, %v1760_v23 }
  0xfb   :  { %1451 = vmatmul.msk.f32.gmra.mxu3 %vm224_vm2, %v1772_v27 }
 0x101   :  { %271 = vmatmul.f32.gmra.mxu1 %v1769_v26 }
 0x109   :  { %274 = vmatmul.f32.gmra.mxu1 %v1776_v28 }
 0x111   :  { %277 = vmatmul.f32.gmra.mxu1 %v1779_v29 }
 0x119   :  { %280 = vmatmul.f32.gmra.mxu1 %v1782_v31 }
 0x121   :  { %283 = vmatmul.f32.gmra.mxu1 %v1785_v32 }
 0x129   :  { %286 = vmatmul.f32.gmra.mxu1 %v1788_v33 }
 0x165   :  { %v307_v34 = vpop.f32.mrf.mxu2 }
 0x16d   :  { %v310_v48 = vpop.f32.mrf.mxu2 }
 0x16e   :  { %v266_v38 = vpop.f32.mrf.mxu1 }
 0x16f   :  { %v1803_v44 = vadd.f32 %v307_v34, %v266_v38 }
 0x171   :  { %v333_v49 = vmul.f32 %v1795_v39, %v1803_v44  ;;  %v405_v51 = vmul.f32 %v1797_v41, %v1803_v44  ;;  %v369_v52 = vmul.f32 %v1799_v42, %v1803_v44 }
 0x173   :  { %v351_v54 = vadd.f32 %v343_v46, %v333_v49  ;;  %v423_v55 = vadd.f32 %v415_v47, %v405_v51  ;;  %v387_v56 = vadd.f32 %v379_v53, %v369_v52  ;;  %v346_v51 = vmul.f32 %v1791_v36, %v1695_v30 }
 0x174   :  { %v418_v52 = vmul.f32 %v1793_v37, %v1695_v30 }
 0x175   :  { %359 = vst.msk [vmem:[#allocation2] sm:$0xff] %vm139_vm1, %v351_v54  ;;  %v313_v1 = vpop.f32.mrf.mxu2 }
 0x176   :  { %431 = vst.msk [vmem:[#allocation2 + $0x80] sm:$0xff] %vm139_vm1, %v423_v55  ;;  %v269_v57 = vpop.f32.mrf.mxu1 }
 0x177   :  { %v1819_v58 = vadd.f32 %v310_v48, %v269_v57  ;;  %395 = vst.msk [vmem:[#allocation2 + $0x40] sm:$0xff] %vm139_vm1, %v387_v56  ;;  %v319_v48 = vpop.f32.mrf.mxu3  ;;  %v382_v56 = vmul.f32 %v1801_v43, %v1695_v30 }
 0x179   :  { %v334_v61 = vmul.f32 %v1795_v39, %v1819_v58  ;;  %v406_v62 = vmul.f32 %v1797_v41, %v1819_v58  ;;  %v370_v63 = vmul.f32 %v1799_v42, %v1819_v58 }
 0x17b   :  { %v352_v2 = vadd.f32 %v344_v59, %v334_v61  ;;  %v424_v3 = vadd.f32 %v416_v60, %v406_v62  ;;  %v388_v4 = vadd.f32 %v380_v0, %v370_v63  ;;  %v347_v63 = vmul.f32 %v1791_v36, %v1703_v35 }
 0x17c   :  { %v419_v0 = vmul.f32 %v1793_v37, %v1703_v35 }
 0x17d   :  { %360 = vst.msk [vmem:[#allocation2 + $0x8] sm:$0xff] %vm139_vm1, %v352_v2  ;;  %v316_v46 = vpop.f32.mrf.mxu2 }
 0x17e   :  { %432 = vst.msk [vmem:[#allocation2 + $0x88] sm:$0xff] %vm139_vm1, %v424_v3  ;;  %v272_v6 = vpop.f32.mrf.mxu1 }
 0x17f   :  { %v1836_v7 = vadd.f32 %v313_v1, %v272_v6  ;;  %396 = vst.msk [vmem:[#allocation2 + $0x48] sm:$0xff] %vm139_vm1, %v388_v4  ;;  %v322_v1 = vpop.f32.mrf.mxu3  ;;  %v383_v6 = vmul.f32 %v1801_v43, %v1703_v35 }
 0x181   :  { %v335_v10 = vmul.f32 %v1795_v39, %v1836_v7  ;;  %v407_v12 = vmul.f32 %v1797_v41, %v1836_v7  ;;  %v371_v14 = vmul.f32 %v1799_v42, %v1836_v7 }
 0x183   :  { %v353_v18 = vadd.f32 %v345_v8, %v335_v10  ;;  %v425_v34 = vadd.f32 %v417_v9, %v407_v12  ;;  %v389_v38 = vadd.f32 %v381_v16, %v371_v14 }
 0x185   :  { %361 = vst.msk [vmem:[#allocation2 + $0x10] sm:$0xff] %vm139_vm1, %v353_v18  ;;  %v348_v18 = vmul.f32 %v1791_v36, %v1711_v40 }
 0x186   :  { %433 = vst.msk [vmem:[#allocation2 + $0x90] sm:$0xff] %vm139_vm1, %v425_v34  ;;  %v275_v47 = vpop.f32.mrf.mxu1  ;;  %v420_v34 = vmul.f32 %v1793_v37, %v1711_v40 }
 0x187   :  { %v1853_v49 = vadd.f32 %v316_v46, %v275_v47  ;;  %397 = vst.msk [vmem:[#allocation2 + $0x50] sm:$0xff] %vm139_vm1, %v389_v38  ;;  %v1592_v38 = vmov 0.0  }
 0x189   :  { %v336_v53 = vmul.f32 %v1795_v39, %v1853_v49  ;;  %v408_v54 = vmul.f32 %v1797_v41, %v1853_v49  ;;  %v372_v55 = vmul.f32 %v1799_v42, %v1853_v49 }
 0x18b   :  { %v354_v57 = vadd.f32 %v346_v51, %v336_v53  ;;  %v426_v59 = vadd.f32 %v418_v52, %v408_v54  ;;  %v390_v60 = vadd.f32 %v382_v56, %v372_v55  ;;  %v384_v52 = vmul.f32 %v1801_v43, %v1711_v40  ;;  %v1908_v53 = vld [vmem:[#allocation2 + $0x48] sm:$0xff]  ;;  %v325_v54 = vpop.f32.mrf.mxu3  ;;  %v1911_v55 = vld [vmem:[#allocation2 + $0x40] sm:$0xff] }
 0x18c   :  { %650 = vst.msk [vmem:[#allocation2 + $0x48] sm:$0xff] %vm139_vm1, %v1592_v38 }
 0x18d   :  { %362 = vst.msk [vmem:[#allocation2 + $0x18] sm:$0xff] %vm139_vm1, %v354_v57 }
 0x18e   :  { %434 = vst.msk [vmem:[#allocation2 + $0x98] sm:$0xff] %vm139_vm1, %v426_v59  ;;  %v278_v61 = vpop.f32.mrf.mxu1  ;;  %v1897_v46 = vld [vmem:[#allocation2 + $0x50] sm:$0xff] }
 0x18f   :  { %v1870_v62 = vadd.f32 %v319_v48, %v278_v61  ;;  %398 = vst.msk [vmem:[#allocation2 + $0x58] sm:$0xff] %vm139_vm1, %v390_v60 }
 0x190   :  { %651 = vst.msk [vmem:[#allocation2 + $0x50] sm:$0xff] %vm139_vm1, %v1592_v38 }
 0x191   :  { %v337_v2 = vmul.f32 %v1795_v39, %v1870_v62  ;;  %v409_v3 = vmul.f32 %v1797_v41, %v1870_v62  ;;  %v373_v4 = vmul.f32 %v1799_v42, %v1870_v62  ;;  %649 = vst.msk [vmem:[#allocation2 + $0x40] sm:$0xff] %vm139_vm1, %v1592_v38 }
 0x193   :  { %v355_v8 = vadd.f32 %v347_v63, %v337_v2  ;;  %v427_v9 = vadd.f32 %v419_v0, %v409_v3  ;;  %v391_v10 = vadd.f32 %v383_v6, %v373_v4  ;;  %v349_v0 = vmul.f32 %v1791_v36, %v1719_v45 }
 0x194   :  { %v385_v6 = vmul.f32 %v1801_v43, %v1719_v45 }
 0x195   :  { %363 = vst.msk [vmem:[#allocation2 + $0x20] sm:$0xff] %vm139_vm1, %v355_v8 }
 0x196   :  { %435 = vst.msk [vmem:[#allocation2 + $0xa0] sm:$0xff] %vm139_vm1, %v427_v9  ;;  %v281_v12 = vpop.f32.mrf.mxu1  ;;  %v1890_v16 = vld [vmem:[#allocation2 + $0x58] sm:$0xff] }
 0x197   :  { %v1887_v14 = vadd.f32 %v322_v1, %v281_v12  ;;  %399 = vst.msk [vmem:[#allocation2 + $0x60] sm:$0xff] %vm139_vm1, %v391_v10  ;;  %v421_v1 = vmul.f32 %v1793_v37, %v1719_v45  ;;  %v328_v12 = vpop.f32.mrf.mxu3 }
 0x198   :  { %652 = vst.msk [vmem:[#allocation2 + $0x58] sm:$0xff] %vm139_vm1, %v1592_v38 }
 0x199   :  { %v338_v47 = vmul.f32 %v1795_v39, %v1887_v14  ;;  %v410_v48 = vmul.f32 %v1797_v41, %v1887_v14  ;;  %v374_v51 = vmul.f32 %v1799_v42, %v1887_v14 }
 0x19b   :  { %v356_v56 = vadd.f32 %v348_v18, %v338_v47  ;;  %v428_v57 = vadd.f32 %v420_v34, %v410_v48  ;;  %v392_v59 = vadd.f32 %v384_v52, %v374_v51  ;;  %v350_v48 = vmul.f32 %v1791_v36, %v1727_v50 }
 0x19c   :  { %v422_v51 = vmul.f32 %v1793_v37, %v1727_v50 }
 0x19d   :  { %364 = vst.msk [vmem:[#allocation2 + $0x28] sm:$0xff] %vm139_vm1, %v356_v56 }
 0x19e   :  { %436 = vst.msk [vmem:[#allocation2 + $0xa8] sm:$0xff] %vm139_vm1, %v428_v57  ;;  %v284_v60 = vpop.f32.mrf.mxu1  ;;  %v467_v63 = vld [vmem:[#allocation2 + $0x60] sm:$0xff]  ;;  %v386_v57 = vmul.f32 %v1801_v43, %v1727_v50 }
 0x19f   :  { %v1916_v61 = vadd.f32 %v325_v54, %v284_v60  ;;  %400 = vst.msk [vmem:[#allocation2 + $0x68] sm:$0xff] %vm139_vm1, %v392_v59 }
 0x1a0   :  { %653 = vst.msk [vmem:[#allocation2 + $0x60] sm:$0xff] %vm139_vm1, %v1592_v38 }
 0x1a1   :  { %v339_v2 = vmul.f32 %v1795_v39, %v1916_v61  ;;  %v411_v3 = vmul.f32 %v1797_v41, %v1916_v61  ;;  %v375_v4 = vmul.f32 %v1799_v42, %v1916_v61 }
 0x1a3   :  { %v357_v8 = vadd.f32 %v349_v0, %v339_v2  ;;  %v429_v9 = vadd.f32 %v421_v1, %v411_v3  ;;  %v393_v10 = vadd.f32 %v385_v6, %v375_v4  ;;  %v475_v0 = vld [vmem:[#allocation2 + $0xa0] sm:$0xff]  ;;  %v474_v1 = vld [vmem:[#allocation2 + $0x98] sm:$0xff]  ;;  %v473_v2 = vld [vmem:[#allocation2 + $0x90] sm:$0xff] }
 0x1a4   :  { %v472_v3 = vld [vmem:[#allocation2 + $0x88] sm:$0xff]  ;;  %v459_v6 = vld [vmem:[#allocation2 + $0x20] sm:$0xff] }
 0x1a5   :  { %365 = vst.msk [vmem:[#allocation2 + $0x30] sm:$0xff] %vm139_vm1, %v357_v8  ;;  %v476_v43 = vld [vmem:[#allocation2 + $0xa8] sm:$0xff] }
 0x1a6   :  { %437 = vst.msk [vmem:[#allocation2 + $0xb0] sm:$0xff] %vm139_vm1, %v429_v9  ;;  %v287_v18 = vpop.f32.mrf.mxu1  ;;  %v468_v47 = vld [vmem:[#allocation2 + $0x68] sm:$0xff] }
 0x1a7   :  { %v1934_v34 = vadd.f32 %v328_v12, %v287_v18  ;;  %401 = vst.msk [vmem:[#allocation2 + $0x70] sm:$0xff] %vm139_vm1, %v393_v10  ;;  %v456_v8 = vld [vmem:[#allocation2 + $0x8] sm:$0xff]  ;;  %v1983_v10 = vstv %s1458_s29 }
 0x1a8   :  { %654 = vst.msk [vmem:[#allocation2 + $0x68] sm:$0xff] %vm139_vm1, %v1592_v38  ;;  %v481_v18 = vmul.f32 %v1983_v10, %v1671_v15 }
 0x1a9   :  { %v340_v52 = vmul.f32 %v1795_v39, %v1934_v34  ;;  %v412_v54 = vmul.f32 %v1797_v41, %v1934_v34  ;;  %v376_v56 = vmul.f32 %v1799_v42, %v1934_v34 }
 0x1ab   :  { %v358_v59 = vadd.f32 %v350_v48, %v340_v52  ;;  %v430_v60 = vadd.f32 %v422_v51, %v412_v54  ;;  %v394_v36 = vadd.f32 %v386_v57, %v376_v56  ;;  %v1987_v51 = vstv %s1467_s6 }
 0x1ac   :  { %v461_v4 = vld [vmem:[#allocation2 + $0x30] sm:$0xff]  ;;  %v1989_v52 = vstv %s1468_s30  ;;  %v1991_v54 = vstv %s1470_s7  ;;  %v1993_v56 = vstv %s1471_s4 }
 0x1ad   :  { %366 = vst.msk [vmem:[#allocation2 + $0x38] sm:$0xff] %vm139_vm1, %v358_v59  ;;  %v477_v42 = vld [vmem:[#allocation2 + $0xb0] sm:$0xff]  ;;  %v1995_v59 = vstv %s1469_s8 }
 0x1ae   :  { %438 = vst.msk [vmem:[#allocation2 + $0xb8] sm:$0xff] %vm139_vm1, %v430_v60  ;;  %v469_v37 = vld [vmem:[#allocation2 + $0x70] sm:$0xff]  ;;  %v1997_v60 = vstv %s1472_s9 }
 0x1af   :  { %402 = vst.msk [vmem:[#allocation2 + $0x78] sm:$0xff] %vm139_vm1, %v394_v36 }
 0x1b0   :  { %655 = vst.msk [vmem:[#allocation2 + $0x70] sm:$0xff] %vm139_vm1, %v1592_v38 }
 0x1b5   :  { %v478_v39 = vld [vmem:[#allocation2 + $0xb8] sm:$0xff] }
 0x1b6   :  { %v470_v41 = vld [vmem:[#allocation2 + $0x78] sm:$0xff]  ;;  %562 = vmatpush.msrb.mxu0 %v478_v39 }
 0x1b7   :  { %513 = vmatpush.msrb.mxu3 %v470_v41  ;;  %656 = vst.msk [vmem:[#allocation2 + $0x78] sm:$0xff] %vm139_vm1, %v1592_v38  ;;  %v471_v38 = vld [vmem:[#allocation2 + $0x80] sm:$0xff]  ;;  %v669_v41 = vmul.f32 %v1993_v56, %v1671_v15 }
 0x1b8   :  { %563 = vmatpush.msrb.mxu0 %v477_v42  ;;  %v482_v42 = vmul.f32 %v1983_v10, %v1679_v20 }
 0x1b9   :  { %514 = vmatpush.msrb.mxu3 %v469_v37  ;;  %v607_v37 = vmul.f32 %v1989_v52, %v1671_v15 }
 0x1ba   :  { %564 = vmatpush.msrb.mxu0 %v476_v43 }
 0x1bb   :  { %515 = vmatpush.msrb.mxu3 %v468_v47 }
 0x1bc   :  { %565 = vmatpush.msrb.mxu0 %v475_v0 }
 0x1bd   :  { %516 = vmatpush.msrb.mxu3 %v467_v63  ;;  %v462_v63 = vld [vmem:[#allocation2 + $0x38] sm:$0xff] }
 0x1be   :  { %566 = vmatpush.msrb.mxu0 %v474_v1  ;;  %v625_v1 = vmul.f32 %v1995_v59, %v1803_v44 }
 0x1bf   :  { %517 = vmatpush.msrb.mxu3 %v1890_v16  ;;  %v460_v16 = vld [vmem:[#allocation2 + $0x28] sm:$0xff] }
 0x1c0   :  { %567 = vmatpush.msrb.mxu0 %v473_v2 }
 0x1c1   :  { %518 = vmatpush.msrb.mxu3 %v1897_v46  ;;  %v458_v46 = vld [vmem:[#allocation2 + $0x18] sm:$0xff] }
 0x1c2   :  { %568 = vmatpush.msrb.mxu0 %v472_v3  ;;  %v687_v3 = vmul.f32 %v1997_v60, %v1803_v44 }
 0x1c3   :  { %519 = vmatpush.msrb.mxu3 %v1908_v53  ;;  %v457_v53 = vld [vmem:[#allocation2 + $0x10] sm:$0xff] }
 0x1c4   :  { %569 = vmatpush.msrb.mxu0 %v471_v38 }
 0x1c5   :  { %520 = vmatpush.msrb.mxu3 %v1911_v55  ;;  %1459 = vmatmul.msk.f32.vlgmr.msrb.gmra.mxu0 %vm224_vm2, %v1735_v5  ;;  %v455_v55 = vld [vmem:[#allocation2] sm:$0xff] }
 0x1c7   :  { %521 = vmatpush.msrb.mxu3 %v462_v63 }
 0x1c9   :  { %522 = vmatpush.msrb.mxu3 %v461_v4 }
 0x1cb   :  { %523 = vmatpush.msrb.mxu3 %v460_v16 }
 0x1cd   :  { %524 = vmatpush.msrb.mxu3 %v459_v6  ;;  %1460 = vmatmul.msk.f32.gmra.mxu0 %vm224_vm2, %v1739_v11 }
 0x1cf   :  { %525 = vmatpush.msrb.mxu3 %v458_v46 }
 0x1d1   :  { %526 = vmatpush.msrb.mxu3 %v457_v53  ;;  %v608_v53 = vmul.f32 %v1989_v52, %v1679_v20 }
 0x1d3   :  { %527 = vmatpush.msrb.mxu3 %v456_v8 }
 0x1d5   :  { %528 = vmatpush.msrb.mxu3 %v455_v55  ;;  %1461 = vmatmul.msk.f32.gmra.mxu0 %vm224_vm2, %v1749_v19  ;;  %v670_v55 = vmul.f32 %v1993_v56, %v1679_v20 }
 0x1d6   :  { %529 = vmatmul.f32.vlgmr.msrb.gmra.mxu3 %v1747_v17 }
 0x1dd   :  { %1462 = vmatmul.msk.f32.gmra.mxu0 %vm224_vm2, %v1760_v23 }
 0x1de   :  { %532 = vmatmul.f32.gmra.mxu3 %v1758_v22 }
 0x1e5   :  { %1463 = vmatmul.msk.f32.gmra.mxu0 %vm224_vm2, %v1741_v13 }
 0x1e6   :  { %535 = vmatmul.f32.gmra.mxu3 %v1769_v26 }
 0x1ed   :  { %1464 = vmatmul.msk.f32.gmra.mxu0 %vm224_vm2, %v1752_v21 }
 0x1ee   :  { %538 = vmatmul.f32.gmra.mxu3 %v1776_v28 }
 0x1f5   :  { %1465 = vmatmul.msk.f32.gmra.mxu0 %vm224_vm2, %v1763_v24 }
 0x1f6   :  { %541 = vmatmul.f32.gmra.mxu3 %v1779_v29 }
 0x1fd   :  { %1466 = vmatmul.msk.f32.gmra.mxu0 %vm224_vm2, %v1772_v27 }
 0x1fe   :  { %544 = vmatmul.f32.gmra.mxu3 %v1782_v31 }
 0x206   :  { %547 = vmatmul.f32.gmra.mxu3 %v1785_v32 }
 0x20e   :  { %550 = vmatmul.f32.gmra.mxu3 %v1788_v33 }
 0x242   :  { %v571_v9 = vpop.f32.mrf.mxu0 }
 0x24a   :  { %v574_v12 = vpop.f32.mrf.mxu0 }
 0x252   :  { %v577_v43 = vpop.f32.mrf.mxu0 }
 0x259   :  { %v530_v47 = vpop.f32.mrf.mxu3 }
 0x25a   :  { %v531_v48 = vadd.f32 %v530_v47, %v481_v18  ;;  %v626_v47 = vmul.f32 %v1995_v59, %v1819_v58 }
 0x25c   :  { %v572_v57 = vadd.f32 %v571_v9, %v531_v48  ;;  %v483_v9 = vmul.f32 %v1983_v10, %v1687_v25  ;;  %v688_v48 = vmul.f32 %v1997_v60, %v1819_v58 }
 0x25e   :  { %v597_v36 = vmul.f32 %v1987_v51, %v572_v57  ;;  %v659_v39 = vmul.f32 %v1991_v54, %v572_v57 }
 0x260   :  { %v615_v0 = vadd.f32 %v607_v37, %v597_v36  ;;  %v677_v2 = vadd.f32 %v669_v41, %v659_v39  ;;  %v580_v36 = vpop.f32.mrf.mxu0 }
 0x261   :  { %v533_v38 = vpop.f32.mrf.mxu3 }
 0x262   :  { %v633_v63 = vadd.f32 %v625_v1, %v615_v0  ;;  %v695_v4 = vadd.f32 %v687_v3, %v677_v2  ;;  %v534_v16 = vadd.f32 %v533_v38, %v482_v42  ;;  %v609_v1 = vmul.f32 %v1989_v52, %v1687_v25 }
 0x263   :  { %v671_v3 = vmul.f32 %v1993_v56, %v1687_v25  ;;  %v484_v38 = vmul.f32 %v1983_v10, %v1695_v30 }
 0x264   :  { %641 = vst.msk [vmem:[#allocation2] sm:$0xff] %vm139_vm1, %v633_v63  ;;  %v575_v6 = vadd.f32 %v574_v12, %v534_v16  ;;  %v689_v16 = vmul.f32 %v1997_v60, %v1836_v7 }
 0x265   :  { %703 = vst.msk [vmem:[#allocation2 + $0x80] sm:$0xff] %vm139_vm1, %v695_v4  ;;  %v627_v4 = vmul.f32 %v1995_v59, %v1836_v7 }
 0x266   :  { %v598_v46 = vmul.f32 %v1987_v51, %v575_v6  ;;  %v660_v8 = vmul.f32 %v1991_v54, %v575_v6 }
 0x268   :  { %v616_v18 = vadd.f32 %v608_v53, %v598_v46  ;;  %v678_v12 = vadd.f32 %v670_v55, %v660_v8  ;;  %v583_v55 = vpop.f32.mrf.mxu0 }
 0x269   :  { %v536_v57 = vpop.f32.mrf.mxu3 }
 0x26a   :  { %v634_v37 = vadd.f32 %v626_v47, %v616_v18  ;;  %v696_v39 = vadd.f32 %v688_v48, %v678_v12  ;;  %v537_v41 = vadd.f32 %v536_v57, %v483_v9  ;;  %v742_v18 = vld [vmem:[#allocation2 + $0x78] sm:$0xff]  ;;  %v610_v12 = vmul.f32 %v1989_v52, %v1695_v30 }
 0x26b   :  { %785 = vmatpush.msrb.mxu2 %v742_v18  ;;  %v672_v57 = vmul.f32 %v1993_v56, %v1695_v30  ;;  %v673_v18 = vmul.f32 %v1993_v56, %v1703_v35 }
 0x26c   :  { %642 = vst.msk [vmem:[#allocation2 + $0x8] sm:$0xff] %vm139_vm1, %v634_v37  ;;  %v578_v42 = vadd.f32 %v577_v43, %v537_v41  ;;  %v741_v37 = vld [vmem:[#allocation2 + $0x70] sm:$0xff]  ;;  %v628_v41 = vmul.f32 %v1995_v59, %v1853_v49 }
 0x26d   :  { %704 = vst.msk [vmem:[#allocation2 + $0x88] sm:$0xff] %vm139_vm1, %v696_v39  ;;  %v485_v39 = vmul.f32 %v1983_v10, %v1703_v35  ;;  %786 = vmatpush.msrb.mxu2 %v741_v37  ;;  %v691_v37 = vmul.f32 %v1997_v60, %v1870_v62 }
 0x26e   :  { %v599_v0 = vmul.f32 %v1987_v51, %v578_v42  ;;  %v661_v2 = vmul.f32 %v1991_v54, %v578_v42 }
 0x270   :  { %v617_v63 = vadd.f32 %v609_v1, %v599_v0  ;;  %v679_v43 = vadd.f32 %v671_v3, %v661_v2  ;;  %v690_v0 = vmul.f32 %v1997_v60, %v1853_v49  ;;  %v740_v1 = vld [vmem:[#allocation2 + $0x68] sm:$0xff] }
 0x271   :  { %v539_v6 = vpop.f32.mrf.mxu3  ;;  %787 = vmatpush.msrb.mxu2 %v740_v1 }
 0x272   :  { %v635_v46 = vadd.f32 %v627_v4, %v617_v63  ;;  %v697_v53 = vadd.f32 %v689_v16, %v679_v43  ;;  %v540_v8 = vadd.f32 %v539_v6, %v484_v38  ;;  %v739_v4 = vld [vmem:[#allocation2 + $0x60] sm:$0xff]  ;;  %v738_v16 = vld [vmem:[#allocation2 + $0x58] sm:$0xff]  ;;  %v586_v6 = vpop.f32.mrf.mxu0 }
 0x273   :  { %788 = vmatpush.msrb.mxu2 %v739_v4  ;;  %v487_v4 = vmul.f32 %v1983_v10, %v1719_v45 }
 0x274   :  { %643 = vst.msk [vmem:[#allocation2 + $0x10] sm:$0xff] %vm139_vm1, %v635_v46  ;;  %v581_v9 = vadd.f32 %v580_v36, %v540_v8  ;;  %v737_v46 = vld [vmem:[#allocation2 + $0x50] sm:$0xff]  ;;  %v611_v8 = vmul.f32 %v1989_v52, %v1703_v35 }
 0x275   :  { %705 = vst.msk [vmem:[#allocation2 + $0x90] sm:$0xff] %vm139_vm1, %v697_v53  ;;  %789 = vmatpush.msrb.mxu2 %v738_v16 }
 0x276   :  { %v600_v47 = vmul.f32 %v1987_v51, %v581_v9  ;;  %v662_v48 = vmul.f32 %v1991_v54, %v581_v9 }
 0x277   :  { %790 = vmatpush.msrb.mxu2 %v737_v46 }
 0x278   :  { %v618_v36 = vadd.f32 %v610_v12, %v600_v47  ;;  %v680_v42 = vadd.f32 %v672_v57, %v662_v48  ;;  %v736_v47 = vld [vmem:[#allocation2 + $0x48] sm:$0xff]  ;;  %v629_v48 = vmul.f32 %v1995_v59, %v1870_v62 }
 0x279   :  { %v542_v2 = vpop.f32.mrf.mxu3  ;;  %791 = vmatpush.msrb.mxu2 %v736_v47 }
 0x27a   :  { %v636_v3 = vadd.f32 %v628_v41, %v618_v36  ;;  %v698_v38 = vadd.f32 %v690_v0, %v680_v42  ;;  %v543_v63 = vadd.f32 %v542_v2, %v485_v39  ;;  %v735_v39 = vld [vmem:[#allocation2 + $0x40] sm:$0xff] }
 0x27b   :  { %792 = vmatpush.msrb.mxu2 %v735_v39  ;;  %v488_v39 = vmul.f32 %v1983_v10, %v1727_v50 }
 0x27c   :  { %644 = vst.msk [vmem:[#allocation2 + $0x18] sm:$0xff] %vm139_vm1, %v636_v3  ;;  %v584_v43 = vadd.f32 %v583_v55, %v543_v63  ;;  %v486_v55 = vmul.f32 %v1983_v10, %v1711_v40  ;;  %v612_v3 = vmul.f32 %v1989_v52, %v1711_v40  ;;  %v674_v63 = vmul.f32 %v1993_v56, %v1711_v40 }
 0x27d   :  { %706 = vst.msk [vmem:[#allocation2 + $0x98] sm:$0xff] %vm139_vm1, %v698_v38 }
 0x27e   :  { %v601_v53 = vmul.f32 %v1987_v51, %v584_v43  ;;  %v663_v9 = vmul.f32 %v1991_v54, %v584_v43  ;;  %v589_v43 = vpop.f32.mrf.mxu0 }
 0x280   :  { %v619_v12 = vadd.f32 %v611_v8, %v601_v53  ;;  %v681_v57 = vadd.f32 %v673_v18, %v663_v9  ;;  %v692_v53 = vmul.f32 %v1997_v60, %v1887_v14 }
 0x281   :  { %v545_v36 = vpop.f32.mrf.mxu3 }
 0x282   :  { %v637_v41 = vadd.f32 %v629_v48, %v619_v12  ;;  %v699_v42 = vadd.f32 %v691_v37, %v681_v57  ;;  %v546_v0 = vadd.f32 %v545_v36, %v486_v55  ;;  %v613_v48 = vmul.f32 %v1989_v52, %v1719_v45 }
 0x283   :  { %v675_v37 = vmul.f32 %v1993_v56, %v1719_v45 }
 0x284   :  { %645 = vst.msk [vmem:[#allocation2 + $0x20] sm:$0xff] %vm139_vm1, %v637_v41  ;;  %v587_v1 = vadd.f32 %v586_v6, %v546_v0  ;;  %v630_v6 = vmul.f32 %v1995_v59, %v1887_v14  ;;  %v631_v41 = vmul.f32 %v1995_v59, %v1916_v61  ;;  %v693_v0 = vmul.f32 %v1997_v60, %v1916_v61 }
 0x285   :  { %707 = vst.msk [vmem:[#allocation2 + $0xa0] sm:$0xff] %vm139_vm1, %v699_v42 }
 0x286   :  { %v602_v2 = vmul.f32 %v1987_v51, %v587_v1  ;;  %v664_v38 = vmul.f32 %v1991_v54, %v587_v1 }
 0x288   :  { %v620_v16 = vadd.f32 %v612_v3, %v602_v2  ;;  %v682_v46 = vadd.f32 %v674_v63, %v664_v38  ;;  %v592_v2 = vpop.f32.mrf.mxu0 }
 0x289   :  { %v548_v8 = vpop.f32.mrf.mxu3 }
 0x28a   :  { %v638_v9 = vadd.f32 %v630_v6, %v620_v16  ;;  %v700_v18 = vadd.f32 %v692_v53, %v682_v46  ;;  %v549_v47 = vadd.f32 %v548_v8, %v487_v4  ;;  %v676_v6 = vmul.f32 %v1993_v56, %v1727_v50 }
 0x28b   :  { %v632_v53 = vmul.f32 %v1995_v59, %v1934_v34 }
 0x28c   :  { %646 = vst.msk [vmem:[#allocation2 + $0x28] sm:$0xff] %vm139_vm1, %v638_v9  ;;  %v590_v55 = vadd.f32 %v589_v43, %v549_v47  ;;  %v614_v43 = vmul.f32 %v1989_v52, %v1727_v50  ;;  %v694_v9 = vmul.f32 %v1997_v60, %v1934_v34  ;;  %v731_v60 = vld [vmem:[#allocation2 + $0x20] sm:$0xff] }
 0x28d   :  { %708 = vst.msk [vmem:[#allocation2 + $0xa8] sm:$0xff] %vm139_vm1, %v700_v18 }
 0x28e   :  { %v603_v12 = vmul.f32 %v1987_v51, %v590_v55  ;;  %v665_v57 = vmul.f32 %v1991_v54, %v590_v55 }
 0x290   :  { %v621_v36 = vadd.f32 %v613_v48, %v603_v12  ;;  %v683_v42 = vadd.f32 %v675_v37, %v665_v57  ;;  %v747_v12 = vld [vmem:[#allocation2 + $0xa0] sm:$0xff]  ;;  %v730_v48 = vld [vmem:[#allocation2 + $0x18] sm:$0xff]  ;;  %v729_v37 = vld [vmem:[#allocation2 + $0x10] sm:$0xff] }
 0x291   :  { %v551_v1 = vpop.f32.mrf.mxu3  ;;  %v746_v57 = vld [vmem:[#allocation2 + $0x98] sm:$0xff] }
 0x292   :  { %v639_v3 = vadd.f32 %v631_v41, %v621_v36  ;;  %v701_v38 = vadd.f32 %v693_v0, %v683_v42  ;;  %v552_v63 = vadd.f32 %v551_v1, %v488_v39  ;;  %v745_v39 = vld [vmem:[#allocation2 + $0x90] sm:$0xff]  ;;  %v728_v36 = vld [vmem:[#allocation2 + $0x8] sm:$0xff]  ;;  %v727_v42 = vld [vmem:[#allocation2] sm:$0xff] }
 0x293   :  { %v732_v59 = vld [vmem:[#allocation2 + $0x28] sm:$0xff]  ;;  %v743_v0 = vld [vmem:[#allocation2 + $0x80] sm:$0xff] }
 0x294   :  { %647 = vst.msk [vmem:[#allocation2 + $0x30] sm:$0xff] %vm139_vm1, %v639_v3  ;;  %v593_v4 = vadd.f32 %v592_v2, %v552_v63  ;;  %v748_v55 = vld [vmem:[#allocation2 + $0xa8] sm:$0xff] }
 0x295   :  { %709 = vst.msk [vmem:[#allocation2 + $0xb0] sm:$0xff] %vm139_vm1, %v701_v38  ;;  %v744_v41 = vld [vmem:[#allocation2 + $0x88] sm:$0xff] }
 0x296   :  { %v604_v10 = vmul.f32 %v1987_v51, %v593_v4  ;;  %v666_v16 = vmul.f32 %v1991_v54, %v593_v4 }
 0x298   :  { %v622_v46 = vadd.f32 %v614_v43, %v604_v10  ;;  %v684_v8 = vadd.f32 %v676_v6, %v666_v16 }
 0x29a   :  { %v640_v18 = vadd.f32 %v632_v53, %v622_v46  ;;  %v702_v47 = vadd.f32 %v694_v9, %v684_v8 }
 0x29b   :  { %v733_v54 = vld [vmem:[#allocation2 + $0x30] sm:$0xff] }
 0x29c   :  { %648 = vst.msk [vmem:[#allocation2 + $0x38] sm:$0xff] %vm139_vm1, %v640_v18  ;;  %v749_v56 = vld [vmem:[#allocation2 + $0xb0] sm:$0xff] }
 0x29d   :  { %710 = vst.msk [vmem:[#allocation2 + $0xb8] sm:$0xff] %vm139_vm1, %v702_v47 }
 0x2a3   :  { %v734_v51 = vld [vmem:[#allocation2 + $0x38] sm:$0xff] }
 0x2a4   :  { %793 = vmatpush.msrb.mxu2 %v734_v51  ;;  %v750_v52 = vld [vmem:[#allocation2 + $0xb8] sm:$0xff] }
 0x2a5   :  { %834 = vmatpush.msrb.mxu1 %v750_v52  ;;  %1499 = vmatpush.msra.mxu3 %v750_v52 }
 0x2a6   :  { %794 = vmatpush.msrb.mxu2 %v733_v54 }
 0x2a7   :  { %835 = vmatpush.msrb.mxu1 %v749_v56  ;;  %1500 = vmatpush.msra.mxu3 %v749_v56 }
 0x2a8   :  { %795 = vmatpush.msrb.mxu2 %v732_v59 }
 0x2a9   :  { %836 = vmatpush.msrb.mxu1 %v748_v55  ;;  %1501 = vmatpush.msra.mxu3 %v748_v55 }
 0x2aa   :  { %796 = vmatpush.msrb.mxu2 %v731_v60 }
 0x2ab   :  { %837 = vmatpush.msrb.mxu1 %v747_v12  ;;  %1502 = vmatpush.msra.mxu3 %v747_v12 }
 0x2ac   :  { %797 = vmatpush.msrb.mxu2 %v730_v48 }
 0x2ad   :  { %838 = vmatpush.msrb.mxu1 %v746_v57  ;;  %1503 = vmatpush.msra.mxu3 %v746_v57 }
 0x2ae   :  { %798 = vmatpush.msrb.mxu2 %v729_v37 }
 0x2af   :  { %839 = vmatpush.msrb.mxu1 %v745_v39  ;;  %1504 = vmatpush.msra.mxu3 %v745_v39 }
 0x2b0   :  { %799 = vmatpush.msrb.mxu2 %v728_v36 }
 0x2b1   :  { %840 = vmatpush.msrb.mxu1 %v744_v41  ;;  %1505 = vmatpush.msra.mxu3 %v744_v41 }
 0x2b2   :  { %800 = vmatpush.msrb.mxu2 %v727_v42 }
 0x2b3   :  { %841 = vmatpush.msrb.mxu1 %v743_v0  ;;  %1506 = vmatpush.msra.mxu3 %v743_v0 }
 0x2b4   :  { %801 = vmatmul.f32.vlgmr.msrb.gmra.mxu2 %v1747_v17  ;;  %1474 = vmatmul.msk.f32.vlgmr.msrb.gmra.mxu1 %vm224_vm2, %v1735_v5 }
 0x2b5   :  { %1479 = vmatmul.msk.f32.vlgmr.msra.gmra.mxu3 %vm224_vm2, %v1752_v21  ;;  %v2134_v21 = vstv %s1482_s11 }
 0x2b6   :  { %v871_v63 = vmul.f32 %v2134_v21, %v1836_v7  ;;  %v872_v46 = vmul.f32 %v2134_v21, %v1853_v49  ;;  %v873_v51 = vmul.f32 %v2134_v21, %v1870_v62  ;;  %v874_v60 = vmul.f32 %v2134_v21, %v1887_v14 }
 0x2b7   :  { %v875_v36 = vmul.f32 %v2134_v21, %v1916_v61 }
 0x2bc   :  { %804 = vmatmul.f32.gmra.mxu2 %v1758_v22  ;;  %1475 = vmatmul.msk.f32.gmra.mxu1 %vm224_vm2, %v1739_v11  ;;  %v752_v11 = vstv %s1473_s10 }
 0x2bd   :  { %1480 = vmatmul.msk.f32.gmra.mxu3 %vm224_vm2, %v1763_v24  ;;  %v753_v17 = vmul.f32 %v752_v11, %v1671_v15  ;;  %v755_v2 = vmul.f32 %v752_v11, %v1687_v25  ;;  %v757_v8 = vmul.f32 %v752_v11, %v1703_v35  ;;  %v758_v49 = vmul.f32 %v752_v11, %v1711_v40 }
 0x2be   :  { %v759_v57 = vmul.f32 %v752_v11, %v1719_v45  ;;  %v760_v42 = vmul.f32 %v752_v11, %v1727_v50  ;;  %v876_v45 = vmul.f32 %v2134_v21, %v1934_v34 }
 0x2c4   :  { %807 = vmatmul.f32.gmra.mxu2 %v1769_v26  ;;  %1476 = vmatmul.msk.f32.gmra.mxu1 %vm224_vm2, %v1749_v19 }
 0x2c5   :  { %1481 = vmatmul.msk.f32.gmra.mxu3 %vm224_vm2, %v1772_v27  ;;  %v754_v27 = vmul.f32 %v752_v11, %v1679_v20 }
 0x2cc   :  { %810 = vmatmul.f32.gmra.mxu2 %v1776_v28  ;;  %1477 = vmatmul.msk.f32.gmra.mxu1 %vm224_vm2, %v1760_v23 }
 0x2d4   :  { %813 = vmatmul.f32.gmra.mxu2 %v1779_v29  ;;  %1478 = vmatmul.msk.f32.gmra.mxu1 %vm224_vm2, %v1741_v13  ;;  %v869_v13 = vmul.f32 %v2134_v21, %v1803_v44 }
 0x2dc   :  { %816 = vmatmul.f32.gmra.mxu2 %v1782_v31 }
 0x2e4   :  { %819 = vmatmul.f32.gmra.mxu2 %v1785_v32  ;;  %v870_v32 = vmul.f32 %v2134_v21, %v1819_v58  ;;  %v756_v58 = vmul.f32 %v752_v11, %v1695_v30 }
 0x2ec   :  { %822 = vmatmul.f32.gmra.mxu2 %v1788_v33 }
 0x331   :  { %v843_v5 = vpop.f32.mrf.mxu1 }
 0x337   :  { %v802_v19 = vpop.f32.mrf.mxu2 }
 0x338   :  { %v803_v22 = vadd.f32 %v802_v19, %v753_v17  ;;  %v858_v52 = vpop.f32.mrf.mxu3 }
 0x339   :  { %v846_v23 = vpop.f32.mrf.mxu1 }
 0x33a   :  { %v844_v24 = vadd.f32 %v843_v5, %v803_v22 }
 0x33c   :  { %v2138_v26 = vadd.f32 %v869_v13, %v844_v24  ;;  %v1593_v24 = vmov 32.0  }
 0x33d   :  { %1514 = vrcp.f32 %v1593_v24 }
 0x33e   :  { %v885_v28 = vsel %vm139_vm1, %v2138_v26, 0.0 }
 0x33f   :  { %v805_v29 = vpop.f32.mrf.mxu2  ;;  %886 = vadd.xlane.f32.xlu0 %v885_v28 }
 0x340   :  { %v806_v31 = vadd.f32 %v805_v29, %v754_v27  ;;  %v861_v48 = vpop.f32.mrf.mxu3 }
 0x341   :  { %v849_v33 = vpop.f32.mrf.mxu1 }
 0x342   :  { %v847_v15 = vadd.f32 %v846_v23, %v806_v31 }
 0x343   :  { %v1515_v61 = vpop.eup %1514 }
 0x344   :  { %v2145_v1 = vadd.f32 %v870_v32, %v847_v15  ;;  %v910_v13 = vmul.f32 32.0, %v1515_v61  ;;  %vm914_vm3 = vweird.f32 %v1515_v61 }
 0x346   :  { %v888_v44 = vsel %vm139_vm1, %v2145_v1, 0.0  ;;  %v911_v27 = vsub.f32 1.0, %v910_v13 }
 0x347   :  { %v808_v3 = vpop.f32.mrf.mxu2  ;;  %889 = vadd.xlane.f32.xlu0 %v888_v44 }
 0x348   :  { %v809_v20 = vadd.f32 %v808_v3, %v755_v2  ;;  %v864_v14 = vpop.f32.mrf.mxu3  ;;  %v912_v50 = vmul.f32 %v1515_v61, %v911_v27 }
 0x349   :  { %v852_v10 = vpop.f32.mrf.mxu1 }
 0x34a   :  { %v850_v38 = vadd.f32 %v849_v33, %v809_v20  ;;  %v913_v11 = vadd.f32 %v1515_v61, %v912_v50 }
 0x34c   :  { %v2152_v4 = vadd.f32 %v871_v63, %v850_v38  ;;  %v2182_v28 = vsel %vm914_vm3, %v1515_v61, %v913_v11 }
 0x34e   :  { %v891_v43 = vsel %vm139_vm1, %v2152_v4, 0.0 }
 0x34f   :  { %v811_v16 = vpop.f32.mrf.mxu2  ;;  %892 = vadd.xlane.f32.xlu1 %v891_v43 }
 0x350   :  { %v812_v25 = vadd.f32 %v811_v16, %v756_v58 }
 0x351   :  { %v855_v30 = vpop.f32.mrf.mxu1 }
 0x352   :  { %v853_v6 = vadd.f32 %v852_v10, %v812_v25 }
 0x354   :  { %v2159_v53 = vadd.f32 %v872_v46, %v853_v6 }
 0x356   :  { %v894_v7 = vsel %vm139_vm1, %v2159_v53, 0.0 }
 0x357   :  { %v814_v9 = vpop.f32.mrf.mxu2  ;;  %895 = vadd.xlane.f32.xlu1 %v894_v7 }
 0x358   :  { %v815_v18 = vadd.f32 %v814_v9, %v757_v8 }
 0x35a   :  { %v856_v47 = vadd.f32 %v855_v30, %v815_v18 }
 0x35c   :  { %v2166_v54 = vadd.f32 %v873_v51, %v856_v47 }
 0x35e   :  { %v897_v56 = vsel %vm139_vm1, %v2166_v54, 0.0 }
 0x35f   :  { %v817_v35 = vpop.f32.mrf.mxu2  ;;  %898 = vadd.xlane.f32.xlu2 %v897_v56 }
 0x360   :  { %v818_v59 = vadd.f32 %v817_v35, %v758_v49 }
 0x362   :  { %v859_v55 = vadd.f32 %v858_v52, %v818_v59 }
 0x364   :  { %v882_v12 = vadd.f32 %v874_v60, %v859_v55 }
 0x366   :  { %v900_v62 = vsel %vm139_vm1, %v882_v12, 0.0 }
 0x367   :  { %v820_v37 = vpop.f32.mrf.mxu2  ;;  %901 = vadd.xlane.f32.xlu2 %v900_v62 }
 0x368   :  { %v821_v39 = vadd.f32 %v820_v37, %v759_v57 }
 0x36a   :  { %v862_v40 = vadd.f32 %v861_v48, %v821_v39 }
 0x36c   :  { %v883_v41 = vadd.f32 %v875_v36, %v862_v40 }
 0x36e   :  { %v903_v0 = vsel %vm139_vm1, %v883_v41, 0.0 }
 0x36f   :  { %v823_v5 = vpop.f32.mrf.mxu2  ;;  %904 = vadd.xlane.f32.xlu0 %v903_v0 }
 0x370   :  { %v824_v17 = vadd.f32 %v823_v5, %v760_v42 }
 0x372   :  { %v865_v19 = vadd.f32 %v864_v14, %v824_v17 }
 0x374   :  { %v884_v22 = vadd.f32 %v876_v45, %v865_v19 }
 0x376   :  { %v906_v23 = vsel %vm139_vm1, %v884_v22, 0.0 }
 0x377   :  { %907 = vadd.xlane.f32.xlu1 %v906_v23 }
 0x3b2   :  { %v887_v29 = vpop.xlane.xlu0 %886 }
 0x3b3   :  { %v916_v31 = vmul.f32 %v2182_v28, %v887_v29 }
 0x3b5   :  { %v2186_v15 = vsub.f32 %v2138_v26, %v916_v31 }
 0x3b7   :  { %v932_v34 = vmul.f32 %v2186_v15, %v2186_v15 }
 0x3b9   :  { %v940_v21 = vsel %vm139_vm1, %v932_v34, 0.0 }
 0x3ba   :  { %941 = vadd.xlane.f32.xlu2 %v940_v21  ;;  %v890_v32 = vpop.xlane.xlu0 %889 }
 0x3bb   :  { %v917_v33 = vmul.f32 %v2182_v28, %v890_v32 }
 0x3bd   :  { %v2193_v2 = vsub.f32 %v2145_v1, %v917_v33 }
 0x3bf   :  { %v933_v44 = vmul.f32 %v2193_v2, %v2193_v2 }
 0x3c1   :  { %v943_v3 = vsel %vm139_vm1, %v933_v44, 0.0 }
 0x3c2   :  { %v893_v20 = vpop.xlane.xlu1 %892  ;;  %944 = vadd.xlane.f32.xlu0 %v943_v3 }
 0x3c3   :  { %v918_v26 = vmul.f32 %v2182_v28, %v893_v20 }
 0x3c5   :  { %v2200_v38 = vsub.f32 %v2152_v4, %v918_v26 }
 0x3c7   :  { %v934_v63 = vmul.f32 %v2200_v38, %v2200_v38 }
 0x3c9   :  { %v946_v10 = vsel %vm139_vm1, %v934_v63, 0.0 }
 0x3ca   :  { %947 = vadd.xlane.f32.xlu1 %v946_v10  ;;  %v896_v1 = vpop.xlane.xlu1 %895 }
 0x3cb   :  { %v919_v58 = vmul.f32 %v2182_v28, %v896_v1 }
 0x3cd   :  { %v2207_v43 = vsub.f32 %v2159_v53, %v919_v58 }
 0x3cf   :  { %v935_v16 = vmul.f32 %v2207_v43, %v2207_v43 }
 0x3d1   :  { %v949_v25 = vsel %vm139_vm1, %v935_v16, 0.0 }
 0x3d2   :  { %v899_v6 = vpop.xlane.xlu2 %898  ;;  %950 = vadd.xlane.f32.xlu2 %v949_v25 }
 0x3d3   :  { %v920_v4 = vmul.f32 %v2182_v28, %v899_v6 }
 0x3d5   :  { %v2214_v46 = vsub.f32 %v2166_v54, %v920_v4 }
 0x3d7   :  { %v936_v8 = vmul.f32 %v2214_v46, %v2214_v46 }
 0x3d9   :  { %v952_v7 = vsel %vm139_vm1, %v936_v8, 0.0 }
 0x3da   :  { %v902_v9 = vpop.xlane.xlu2 %901  ;;  %953 = vadd.xlane.f32.xlu0 %v952_v7 }
 0x3db   :  { %v921_v53 = vmul.f32 %v2182_v28, %v902_v9 }
 0x3dd   :  { %v2220_v30 = vsub.f32 %v882_v12, %v921_v53 }
 0x3df   :  { %v937_v18 = vmul.f32 %v2220_v30, %v2220_v30 }
 0x3e1   :  { %v955_v47 = vsel %vm139_vm1, %v937_v18, 0.0 }
 0x3e2   :  { %956 = vadd.xlane.f32.xlu1 %v955_v47  ;;  %v905_v51 = vpop.xlane.xlu0 %904 }
 0x3e3   :  { %v922_v52 = vmul.f32 %v2182_v28, %v905_v51 }
 0x3e5   :  { %v2226_v54 = vsub.f32 %v883_v41, %v922_v52 }
 0x3e7   :  { %v938_v49 = vmul.f32 %v2226_v54, %v2226_v54 }
 0x3e9   :  { %v958_v56 = vsel %vm139_vm1, %v938_v49, 0.0 }
 0x3ea   :  { %v908_v35 = vpop.xlane.xlu1 %907  ;;  %959 = vadd.xlane.f32.xlu2 %v958_v56 }
 0x3eb   :  { %v923_v59 = vmul.f32 %v2182_v28, %v908_v35 }
 0x3ed   :  { %v2232_v55 = vsub.f32 %v884_v22, %v923_v59 }
 0x3ef   :  { %v939_v60 = vmul.f32 %v2232_v55, %v2232_v55 }
 0x3f1   :  { %v961_v12 = vsel %vm139_vm1, %v939_v60, 0.0 }
 0x3f2   :  { %962 = vadd.xlane.f32.xlu0 %v961_v12 }
 0x42d   :  { %v942_v48 = vpop.xlane.xlu2 %941 }
 0x42e   :  { %v964_v57 = vmul.f32 %v942_v48, %v2182_v28 }
 0x430   :  { %v972_v62 = vadd.f32 1e-05, %v964_v57 }
 0x432   :  { %1516 = vrsqrt.f32 %v972_v62  ;;  %vm986_vm5 = vweird.f32 %v972_v62 }
 0x435   :  { %v945_v37 = vpop.xlane.xlu0 %944 }
 0x436   :  { %v965_v39 = vmul.f32 %v945_v37, %v2182_v28 }
 0x438   :  { %v1517_v40 = vpop.eup %1516  ;;  %v973_v36 = vadd.f32 1e-05, %v965_v39 }
 0x439   :  { %v981_v41 = vmul.f32 %v1517_v40, %v972_v62  ;;  %vm987_vm4 = vweird.f32 %v1517_v40 }
 0x43a   :  { %1518 = vrsqrt.f32 %v973_v36  ;;  %vm988_vm6 = vmor %vm986_vm5, %vm987_vm4  ;;  %vm996_vm8 = vweird.f32 %v973_v36 }
 0x43b   :  { %v982_v42 = vmul.f32 %v1517_v40, %v981_v41 }
 0x43d   :  { %v983_v0 = vmul.f32 0.5, %v982_v42  ;;  %v948_v5 = vpop.xlane.xlu1 %947 }
 0x43e   :  { %v966_v14 = vmul.f32 %v948_v5, %v2182_v28 }
 0x43f   :  { %v984_v17 = vsub.f32 1.5, %v983_v0 }
 0x440   :  { %v1519_v19 = vpop.eup %1518  ;;  %v974_v45 = vadd.f32 1e-05, %v966_v14 }
 0x441   :  { %v985_v22 = vmul.f32 %v1517_v40, %v984_v17  ;;  %v991_v23 = vmul.f32 %v1519_v19, %v973_v36  ;;  %vm997_vm7 = vweird.f32 %v1519_v19 }
 0x442   :  { %1520 = vrsqrt.f32 %v974_v45  ;;  %vm998_vm9 = vmor %vm996_vm8, %vm997_vm7  ;;  %vm1006_vm11 = vweird.f32 %v974_v45 }
 0x443   :  { %v989_v24 = vsel %vm988_vm6, %v1517_v40, %v985_v22  ;;  %v992_v61 = vmul.f32 %v1519_v19, %v991_v23 }
 0x444   :  { %v2241_v13 = vmul.f32 %v989_v24, %v2186_v15 }
 0x445   :  { %v993_v27 = vmul.f32 0.5, %v992_v61  ;;  %v951_v50 = vpop.xlane.xlu2 %950 }
 0x446   :  { %v2244_v11 = vmul.f32 0.70710677, %v2241_v13  ;;  %v967_v29 = vmul.f32 %v951_v50, %v2182_v28 }
 0x447   :  { %v994_v31 = vsub.f32 1.5, %v993_v27 }
 0x448   :  { %v1521_v34 = vpop.eup %1520  ;;  %v1084_v21 = vmul.f32 %v2244_v11, %v2244_v11  ;;  %v2249_v32 = vadd.f32 1e-05, %v967_v29 }
 0x449   :  { %v995_v33 = vmul.f32 %v1519_v19, %v994_v31  ;;  %v1001_v44 = vmul.f32 %v1521_v34, %v974_v45  ;;  %vm1007_vm10 = vweird.f32 %v1521_v34 }
 0x44a   :  { %v2251_v15 = vmin.f32 %v1084_v21, 16.0  ;;  %1522 = vrsqrt.f32 %v2249_v32  ;;  %vm1008_vm12 = vmor %vm1006_vm11, %vm1007_vm10  ;;  %vm1016_vm14 = vweird.f32 %v2249_v32 }
 0x44b   :  { %v999_v3 = vsel %vm998_vm9, %v1519_v19, %v995_v33  ;;  %v1002_v20 = vmul.f32 %v1521_v34, %v1001_v44 }
 0x44c   :  { %v1086_v26 = vmul.f32 2.1237322e-06, %v2251_v15  ;;  %v1097_v63 = vmul.f32 3.8918573e-05, %v2251_v15  ;;  %v2257_v10 = vmul.f32 %v999_v3, %v2193_v2 }
 0x44d   :  { %v1003_v1 = vmul.f32 0.5, %v1002_v20  ;;  %v954_v58 = vpop.xlane.xlu0 %953 }
 0x44e   :  { %v1087_v16 = vadd.f32 0.00028619796, %v1086_v26  ;;  %v1098_v25 = vadd.f32 0.001143296, %v1097_v63  ;;  %v968_v6 = vmul.f32 %v954_v58, %v2182_v28  ;;  %v2261_v4 = vmul.f32 0.70710677, %v2257_v10 }
 0x44f   :  { %v1004_v8 = vsub.f32 1.5, %v1003_v1 }
 0x450   :  { %v1523_v7 = vpop.eup %1522  ;;  %v1088_v9 = vmul.f32 %v1087_v16, %v2251_v15  ;;  %v1099_v53 = vmul.f32 %v1098_v25, %v2251_v15  ;;  %v2265_v18 = vadd.f32 1e-05, %v968_v6  ;;  %v1124_v2 = vmul.f32 %v2261_v4, %v2261_v4 }
 0x451   :  { %v1005_v47 = vmul.f32 %v1521_v34, %v1004_v8  ;;  %v1011_v51 = vmul.f32 %v1523_v7, %v2249_v32  ;;  %vm1017_vm13 = vweird.f32 %v1523_v7 }
 0x452   :  { %v1089_v52 = vadd.f32 0.0036580483, %v1088_v9  ;;  %v1100_v49 = vadd.f32 0.014752088, %v1099_v53  ;;  %1524 = vrsqrt.f32 %v2265_v18  ;;  %v2271_v56 = vmin.f32 %v1124_v2, 16.0  ;;  %vm1018_vm15 = vmor %vm1016_vm14, %vm1017_vm13 }
 0x453   :  { %v1009_v35 = vsel %vm1008_vm12, %v1521_v34, %v1005_v47  ;;  %v1012_v59 = vmul.f32 %v1523_v7, %v1011_v51  ;;  %v2320_v51 = vmul.f32 0.5, %v2241_v13  ;;  %vm1026_vm0 = vweird.f32 %v2265_v18 }
 0x454   :  { %v1090_v60 = vmul.f32 %v1089_v52, %v2251_v15  ;;  %v1101_v12 = vmul.f32 %v1100_v49, %v2251_v15  ;;  %v2276_v48 = vmul.f32 %v1009_v35, %v2200_v38  ;;  %v1126_v57 = vmul.f32 2.1237322e-06, %v2271_v56 }
 0x455   :  { %v1137_v62 = vmul.f32 3.8918573e-05, %v2271_v56  ;;  %v1013_v37 = vmul.f32 0.5, %v1012_v59  ;;  %v957_v39 = vpop.xlane.xlu1 %956 }
 0x456   :  { %v1091_v40 = vadd.f32 0.05243302, %v1090_v60  ;;  %v1102_v36 = vadd.f32 0.112945676, %v1101_v12  ;;  %v969_v41 = vmul.f32 %v957_v39, %v2182_v28  ;;  %v1127_v42 = vadd.f32 0.00028619796, %v1126_v57 }
 0x457   :  { %v1138_v0 = vadd.f32 0.001143296, %v1137_v62  ;;  %v2282_v5 = vmul.f32 0.70710677, %v2276_v48  ;;  %v1014_v19 = vsub.f32 1.5, %v1013_v37 }
 0x458   :  { %v2284_v14 = vpop.eup %1524  ;;  %v1092_v38 = vmul.f32 %v1091_v40, %v2251_v15  ;;  %v1103_v17 = vmul.f32 %v1102_v36, %v2251_v15  ;;  %v2288_v45 = vadd.f32 1e-05, %v969_v41  ;;  %v1128_v22 = vmul.f32 %v1127_v42, %v2271_v56 }
 0x459   :  { %v1139_v23 = vmul.f32 %v1138_v0, %v2271_v56  ;;  %v1164_v24 = vmul.f32 %v2282_v5, %v2282_v5  ;;  %v1021_v61 = vmul.f32 %v2284_v14, %v2265_v18  ;;  %v1015_v50 = vmul.f32 %v1523_v7, %v1014_v19 }
 0x45a   :  { %v1104_v27 = vadd.f32 0.4994258, %v1103_v17  ;;  %v1129_v29 = vadd.f32 0.0036580483, %v1128_v22  ;;  %1526 = vrsqrt.f32 %v2288_v45  ;;  %v1093_v3 = vadd.f32 0.18741608, %v1092_v38 }
 0x45b   :  { %v1140_v31 = vadd.f32 0.014752088, %v1139_v23  ;;  %v2297_v34 = vmin.f32 %v1164_v24, 16.0  ;;  %v1022_v21 = vmul.f32 %v2284_v14, %v1021_v61  ;;  %v1019_v44 = vsel %vm1018_vm15, %v1523_v7, %v1015_v50 }
 0x45c   :  { %v1105_v33 = vmul.f32 %v1104_v27, %v2251_v15  ;;  %v1130_v20 = vmul.f32 %v1129_v29, %v2271_v56  ;;  %v2310_v58 = vmul.f32 %v1019_v44, %v2207_v43  ;;  %v1094_v7 = vmul.f32 %v1093_v3, %v2251_v15 }
 0x45d   :  { %v1141_v26 = vmul.f32 %v1140_v31, %v2271_v56  ;;  %v1166_v32 = vmul.f32 2.1237322e-06, %v2297_v34  ;;  %v1177_v1 = vmul.f32 3.8918573e-05, %v2297_v34  ;;  %v1023_v16 = vmul.f32 0.5, %v1022_v21 }
 0x45e   :  { %v2306_v63 = vadd.f32 1.0, %v1105_v33  ;;  %v1131_v25 = vadd.f32 0.05243302, %v1130_v20  ;;  %v2323_v52 = vmul.f32 0.70710677, %v2310_v58  ;;  %vm1027_vm2 = vweird.f32 %v2284_v14 }
 0x45f   :  { %v1142_v6 = vadd.f32 0.112945676, %v1141_v26  ;;  %v1167_v8 = vadd.f32 0.00028619796, %v1166_v32  ;;  %v1178_v43 = vadd.f32 0.001143296, %v1177_v1  ;;  %vm2353_vm5 = vmor %vm1026_vm0, %vm1027_vm2  ;;  %vm1036_vm7 = vweird.f32 %v2288_v45 }
 0x460   :  { %1528 = vrcp.f32 %v2306_v63  ;;  %v1132_v9 = vmul.f32 %v1131_v25, %v2271_v56  ;;  %v2317_v47 = vpop.eup %1526  ;;  %v1024_v59 = vsub.f32 1.5, %v1023_v16  ;;  %v1204_v12 = vmul.f32 %v2323_v52, %v2323_v52 }
 0x461   :  { %v1143_v53 = vmul.f32 %v1142_v6, %v2271_v56  ;;  %v1168_v2 = vmul.f32 %v1167_v8, %v2297_v34  ;;  %v1179_v60 = vmul.f32 %v1178_v43, %v2297_v34  ;;  %v1095_v57 = vadd.f32 1.1283791, %v1094_v7 }
 0x462   :  { %v1133_v49 = vadd.f32 0.18741608, %v1132_v9  ;;  %v1116_v13 = vand.u32 2147483647, %v2306_v63  ;;  %v1031_v37 = vmul.f32 %v2317_v47, %v2288_v45  ;;  %v2336_v42 = vmin.f32 %v1204_v12, 16.0 }
 0x463   :  { %v1144_v35 = vadd.f32 0.4994258, %v1143_v53  ;;  %v1169_v15 = vadd.f32 0.0036580483, %v1168_v2  ;;  %v1180_v41 = vadd.f32 0.014752088, %v1179_v60  ;;  %v1025_v19 = vmul.f32 %v2284_v14, %v1024_v59 }
 0x464   :  { %v1134_v40 = vmul.f32 %v1133_v49, %v2271_v56  ;;  %v1118_v38 = vand.u32 2147483648, %v2306_v63  ;;  %v1206_v24 = vmul.f32 2.1237322e-06, %v2336_v42  ;;  %v1096_v61 = vmul.f32 %v1095_v57, %v2244_v11 }
 0x465   :  { %v1145_v62 = vmul.f32 %v1144_v35, %v2271_v56  ;;  %v1170_v36 = vmul.f32 %v1169_v15, %v2297_v34  ;;  %v1181_v23 = vmul.f32 %v1180_v41, %v2297_v34  ;;  %v1217_v56 = vmul.f32 3.8918573e-05, %v2336_v42  ;;  %v960_v35 = vpop.xlane.xlu2 %959 }
 0x466   :  { %v1529_v39 = vpop.eup %1528  ;;  %vm1112_vm3 = vweird.f32 %v2306_v63  ;;  %v1135_v50 = vadd.f32 1.1283791, %v1134_v40  ;;  %v1032_v21 = vmul.f32 %v2317_v47, %v1031_v37  ;;  %v1207_v11 = vadd.f32 0.00028619796, %v1206_v24 }
 0x467   :  { %v1108_v0 = vmul.f32 %v1529_v39, %v2306_v63  ;;  %v2340_v17 = vadd.f32 1.0, %v1145_v62  ;;  %v1171_v22 = vadd.f32 0.05243302, %v1170_v36  ;;  %vm1113_vm4 = vweird.f32 %v1529_v39 }
 0x468   :  { %v1182_v29 = vadd.f32 0.112945676, %v1181_v23  ;;  %v1218_v44 = vadd.f32 0.001143296, %v1217_v56  ;;  %v1029_v3 = vsel %vm2353_vm5, %v2284_v14, %v1025_v19  ;;  %vm2361_vm6 = vcmp.eq.f32.partialorder %v1116_v13, 8.507059e+37  ;;  %vm1114_vm9 = vmor %vm1112_vm3, %vm1113_vm4 }
 0x469   :  { %v1109_v27 = vsub.f32 1.0, %v1108_v0  ;;  %1530 = vrcp.f32 %v2340_v17  ;;  %v1119_v26 = vor.u32 1.1754944e-38, %v1118_v38  ;;  %v1172_v18 = vmul.f32 %v1171_v22, %v2297_v34 }
 0x46a   :  { %v1183_v32 = vmul.f32 %v1182_v29, %v2297_v34  ;;  %v1208_v16 = vmul.f32 %v1207_v11, %v2336_v42  ;;  %v1219_v25 = vmul.f32 %v1218_v44, %v2336_v42  ;;  %vm1037_vm8 = vweird.f32 %v2317_v47 }
 0x46b   :  { %v1110_v33 = vmul.f32 %v1529_v39, %v1109_v27  ;;  %v1136_v14 = vmul.f32 %v1135_v50, %v2261_v4  ;;  %v2376_v8 = vmul.f32 %v1029_v3, %v2214_v46  ;;  %v1033_v7 = vmul.f32 0.5, %v1032_v21  ;;  %vm1038_vm12 = vmor %vm1036_vm7, %vm1037_vm8 }
 0x46c   :  { %v1184_v6 = vadd.f32 0.4994258, %v1183_v32  ;;  %v1156_v2 = vand.u32 2147483647, %v2340_v17  ;;  %v1209_v43 = vadd.f32 0.0036580483, %v1208_v16  ;;  %vm1152_vm11 = vweird.f32 %v2340_v17 }
 0x46d   :  { %v1111_v1 = vadd.f32 %v1529_v39, %v1110_v33  ;;  %v1220_v49 = vadd.f32 0.014752088, %v1219_v25  ;;  %v1158_v15 = vand.u32 2147483648, %v2340_v17  ;;  %v1173_v4 = vadd.f32 0.18741608, %v1172_v18 }
 0x46e   :  { %v1185_v46 = vmul.f32 %v1184_v6, %v2297_v34  ;;  %v1210_v12 = vmul.f32 %v1209_v43, %v2336_v42  ;;  %v2387_v62 = vmul.f32 0.70710677, %v2376_v8  ;;  %v1034_v37 = vsub.f32 1.5, %v1033_v7 }
 0x46f   :  { %v1531_v9 = vpop.eup %1530  ;;  %v1115_v53 = vsel %vm1114_vm9, %v1529_v39, %v1111_v1  ;;  %v1221_v57 = vmul.f32 %v1220_v49, %v2336_v42  ;;  %v970_v39 = vmul.f32 %v960_v35, %v2182_v28  ;;  %v1159_v24 = vor.u32 1.1754944e-38, %v1158_v15 }
 0x470   :  { %v1120_v59 = vsel %vm2361_vm6, %v1119_v26, %v1115_v53  ;;  %v1148_v63 = vmul.f32 %v1531_v9, %v2340_v17  ;;  %v2390_v36 = vadd.f32 1.0, %v1185_v46  ;;  %v1211_v41 = vadd.f32 0.05243302, %v1210_v12 }
 0x471   :  { %v1121_v60 = vmul.f32 %v1120_v59, %v1096_v61  ;;  %v1222_v0 = vadd.f32 0.112945676, %v1221_v57  ;;  %vm1153_vm10 = vweird.f32 %v1531_v9  ;;  %v1244_v19 = vmul.f32 %v2387_v62, %v2387_v62 }
 0x472   :  { %v1149_v13 = vsub.f32 1.0, %v1148_v63  ;;  %v1035_v22 = vmul.f32 %v2317_v47, %v1034_v37  ;;  %1532 = vrcp.f32 %v2390_v36  ;;  %v1212_v61 = vmul.f32 %v1211_v41, %v2336_v42  ;;  %vm1154_vm13 = vmor %vm1152_vm11, %vm1153_vm10 }
 0x473   :  { %v1483_v40 = vclamps-f32 %v1121_v60, 1.0  ;;  %v1223_v27 = vmul.f32 %v1222_v0, %v2336_v42  ;;  %v2403_v50 = vadd.f32 1e-05, %v970_v39  ;;  %v1174_v17 = vmul.f32 %v1173_v4, %v2297_v34 }
 0x474   :  { %v1150_v38 = vmul.f32 %v1531_v9, %v1149_v13  ;;  %v2407_v31 = vmin.f32 %v1244_v19, 16.0  ;;  %v1039_v21 = vsel %vm1038_vm12, %v2317_v47, %v1035_v22  ;;  %vm1157_vm14 = vcmp.eq.f32.partialorder %v1156_v2, 8.507059e+37 }
 0x475   :  { %v1404_v23 = vadd.f32 1.0, %v1483_v40  ;;  %v1213_v11 = vadd.f32 0.18741608, %v1212_v61  ;;  %v1224_v44 = vadd.f32 0.4994258, %v1223_v27  ;;  %v2417_v34 = vmul.f32 %v1039_v21, %v2220_v30 }
 0x476   :  { %v1151_v56 = vadd.f32 %v1531_v9, %v1150_v38  ;;  %v1246_v3 = vmul.f32 2.1237322e-06, %v2407_v31  ;;  %1534 = vrsqrt.f32 %v2403_v50  ;;  %v1175_v18 = vadd.f32 1.1283791, %v1174_v17 }
 0x477   :  { %v1412_v29 = vmul.f32 %v1404_v23, %v2320_v51  ;;  %v1257_v51 = vmul.f32 3.8918573e-05, %v2407_v31  ;;  %v1225_v47 = vmul.f32 %v1224_v44, %v2336_v42  ;;  %v1214_v32 = vmul.f32 %v1213_v11, %v2336_v42  ;;  %v963_v42 = vpop.xlane.xlu0 %962 }
 0x478   :  { %v1155_v33 = vsel %vm1154_vm13, %v1531_v9, %v1151_v56  ;;  %v1533_v26 = vpop.eup %1532  ;;  %v1247_v1 = vadd.f32 0.00028619796, %v1246_v3  ;;  %v1069_v25 = vmul.f32 0.5, %v2257_v10  ;;  %v2424_v7 = vmul.f32 0.5, %v2276_v48 }
 0x479   :  { %1420 = vst.msk [vmem:[%s2565_s5] sm:$0xff] %vm139_vm1, %v1412_v29  ;;  %v1160_v45 = vsel %vm1157_vm14, %v1159_v24, %v1155_v33  ;;  %v1258_v16 = vadd.f32 0.001143296, %v1257_v51  ;;  %v1188_v30 = vmul.f32 %v1533_v26, %v2390_v36  ;;  %v2428_v9 = vadd.f32 1.0, %v1225_v47 }
 0x47a   :  { %v1161_v20 = vmul.f32 %v1160_v45, %v1136_v14  ;;  %v1196_v14 = vand.u32 2147483647, %v2390_v36  ;;  %v2432_v2 = vmul.f32 0.70710677, %v2417_v34  ;;  %v1198_v10 = vand.u32 2147483648, %v2390_v36 }
 0x47b   :  { %v1259_v53 = vmul.f32 %v1258_v16, %v2407_v31  ;;  %v1189_v49 = vsub.f32 1.0, %v1188_v30  ;;  %v1248_v35 = vmul.f32 %v1247_v1, %v2407_v31  ;;  %v1176_v48 = vmul.f32 %v1175_v18, %v2282_v5 }
 0x47c   :  { %v1484_v6 = vclamps-f32 %v1161_v20, 1.0  ;;  %vm1193_vm15 = vweird.f32 %v1533_v26  ;;  %v1215_v59 = vadd.f32 1.1283791, %v1214_v32  ;;  %1536 = vrcp.f32 %v2428_v9  ;;  %v1535_v63 = vpop.eup %1534 }
 0x47d   :  { %v1190_v4 = vmul.f32 %v1533_v26, %v1189_v49  ;;  %v1260_v60 = vadd.f32 0.014752088, %v1259_v53  ;;  %v971_v46 = vmul.f32 %v963_v42, %v2182_v28  ;;  %vm1192_vm0 = vweird.f32 %v2390_v36 }
 0x47e   :  { %v1405_v43 = vadd.f32 1.0, %v1484_v6  ;;  %vm2440_vm2 = vcmp.eq.f32.partialorder %v1196_v14, 8.507059e+37  ;;  %v1284_v57 = vmul.f32 %v2432_v2, %v2432_v2  ;;  %v1041_v5 = vmul.f32 %v1535_v63, %v2403_v50  ;;  %vm1194_vm3 = vmor %vm1192_vm0, %vm1193_vm15 }
 0x47f   :  { %v1191_v13 = vadd.f32 %v1533_v26, %v1190_v4  ;;  %v1199_v37 = vor.u32 1.1754944e-38, %v1198_v10  ;;  %v1249_v39 = vadd.f32 0.0036580483, %v1248_v35  ;;  %v1261_v28 = vmul.f32 %v1260_v60, %v2407_v31 }
 0x480   :  { %v1413_v15 = vmul.f32 %v1405_v43, %v1069_v25  ;;  %v1216_v40 = vmul.f32 %v1215_v59, %v2323_v52  ;;  %v2454_v36 = vmin.f32 %v1284_v57, 16.0  ;;  %v1042_v41 = vmul.f32 %v1535_v63, %v1041_v5 }
 0x481   :  { %vm1046_vm4 = vweird.f32 %v2403_v50  ;;  %v1195_v0 = vsel %vm1194_vm3, %v1533_v26, %v1191_v13  ;;  %v1236_v38 = vand.u32 2147483647, %v2428_v9  ;;  %v1262_v19 = vadd.f32 0.112945676, %v1261_v28 }
 0x482   :  { %1421 = vst.msk [vmem:[%s2565_s5 + $0x8] sm:$0xff] %vm139_vm1, %v1413_v15  ;;  %v2458_v22 = vadd.f32 1e-05, %v971_v46  ;;  %v1537_v23 = vpop.eup %1536  ;;  %v1200_v24 = vsel %vm2440_vm2, %v1199_v37, %v1195_v0  ;;  %v1286_v56 = vmul.f32 2.1237322e-06, %v2454_v36  ;;  %v1043_v52 = vmul.f32 0.5, %v1042_v41 }
 0x483   :  { %v1297_v61 = vmul.f32 3.8918573e-05, %v2454_v36  ;;  %v1201_v27 = vmul.f32 %v1200_v24, %v1176_v48  ;;  %v1228_v29 = vmul.f32 %v1537_v23, %v2428_v9  ;;  %v1250_v17 = vmul.f32 %v1249_v39, %v2407_v31 }
 0x484   :  { %vm1047_vm5 = vweird.f32 %v1535_v63  ;;  %v1263_v21 = vmul.f32 %v1262_v19, %v2407_v31  ;;  %v1287_v33 = vadd.f32 0.00028619796, %v1286_v56  ;;  %v1044_v44 = vsub.f32 1.5, %v1043_v52 }
 0x485   :  { %v1298_v11 = vadd.f32 0.001143296, %v1297_v61  ;;  %v1485_v45 = vclamps-f32 %v1201_v27, 1.0  ;;  %v1229_v3 = vsub.f32 1.0, %v1228_v29  ;;  %v1238_v51 = vand.u32 2147483648, %v2428_v9  ;;  %vm1048_vm7 = vmor %vm1046_vm4, %vm1047_vm5 }
 0x486   :  { %1538 = vrsqrt.f32 %v2458_v22  ;;  %v1264_v20 = vadd.f32 0.4994258, %v1263_v21  ;;  %v1288_v47 = vmul.f32 %v1287_v33, %v2454_v36  ;;  %v1045_v18 = vmul.f32 %v1535_v63, %v1044_v44 }
 0x487   :  { %v1299_v26 = vmul.f32 %v1298_v11, %v2454_v36  ;;  %v1406_v32 = vadd.f32 1.0, %v1485_v45  ;;  %v1230_v1 = vmul.f32 %v1537_v23, %v1229_v3  ;;  %vm1233_vm6 = vweird.f32 %v1537_v23 }
 0x488   :  { %v1251_v16 = vadd.f32 0.05243302, %v1250_v17  ;;  %v1265_v25 = vmul.f32 %v1264_v20, %v2407_v31  ;;  %v1289_v6 = vadd.f32 0.0036580483, %v1288_v47  ;;  %v1049_v14 = vsel %vm1048_vm7, %v1535_v63, %v1045_v18 }
 0x489   :  { %v1300_v30 = vadd.f32 0.014752088, %v1299_v26  ;;  %v1414_v53 = vmul.f32 %v1406_v32, %v2424_v7  ;;  %v1231_v42 = vadd.f32 %v1537_v23, %v1230_v1  ;;  %vm1232_vm8 = vweird.f32 %v2428_v9 }
 0x48a   :  { %v2478_v43 = vmul.f32 %v1049_v14, %v2226_v54  ;;  %vm1234_vm9 = vmor %vm1232_vm8, %vm1233_vm6  ;;  %vm1237_vm10 = vcmp.eq.f32.partialorder %v1236_v38, 8.507059e+37  ;;  %v1239_v49 = vor.u32 1.1754944e-38, %v1238_v51  ;;  %v1266_v10 = vadd.f32 1.0, %v1265_v25 }
 0x48b   :  { %v1301_v50 = vmul.f32 %v1300_v30, %v2454_v36  ;;  %1422 = vst.msk [vmem:[%s2565_s5 + $0x10] sm:$0xff] %vm139_vm1, %v1414_v53  ;;  %v1235_v48 = vsel %vm1234_vm9, %v1537_v23, %v1231_v42  ;;  %v1252_v7 = vmul.f32 %v1251_v16, %v2407_v31  ;;  %v1290_v9 = vmul.f32 %v1289_v6, %v2454_v36 }
 0x48c   :  { %v1539_v35 = vpop.eup %1538  ;;  %v2488_v54 = vmul.f32 0.70710677, %v2478_v43  ;;  %v1240_v59 = vsel %vm1237_vm10, %v1239_v49, %v1235_v48  ;;  %1540 = vrcp.f32 %v1266_v10  ;;  %v1071_v39 = vmul.f32 0.5, %v2310_v58 }
 0x48d   :  { %v1241_v63 = vmul.f32 %v1240_v59, %v1216_v40  ;;  %v1302_v15 = vadd.f32 0.112945676, %v1301_v50  ;;  %v1051_v60 = vmul.f32 %v1539_v35, %v2458_v22  ;;  %v1253_v12 = vadd.f32 0.18741608, %v1252_v7 }
 0x48e   :  { %v1324_v4 = vmul.f32 %v2488_v54, %v2488_v54  ;;  %v1291_v57 = vadd.f32 0.05243302, %v1290_v9  ;;  %v1278_v21 = vand.u32 2147483648, %v1266_v10  ;;  %vm1056_vm11 = vweird.f32 %v2458_v22 }
 0x48f   :  { %v1486_v46 = vclamps-f32 %v1241_v63, 1.0  ;;  %v1303_v5 = vmul.f32 %v1302_v15, %v2454_v36  ;;  %v1052_v37 = vmul.f32 %v1539_v35, %v1051_v60  ;;  %v1254_v24 = vmul.f32 %v1253_v12, %v2407_v31 }
 0x490   :  { %v2494_v13 = vmin.f32 %v1324_v4, 16.0  ;;  %v1292_v61 = vmul.f32 %v1291_v57, %v2454_v36  ;;  %vm1057_vm12 = vweird.f32 %v1539_v35  ;;  %v1276_v51 = vand.u32 2147483647, %v1266_v10 }
 0x491   :  { %v1407_v28 = vadd.f32 1.0, %v1486_v46  ;;  %v1304_v41 = vadd.f32 0.4994258, %v1303_v5  ;;  %v1053_v19 = vmul.f32 0.5, %v1052_v37  ;;  %v1255_v45 = vadd.f32 1.1283791, %v1254_v24  ;;  %vm1058_vm15 = vmor %vm1056_vm11, %vm1057_vm12 }
 0x492   :  { %v1541_v0 = vpop.eup %1540  ;;  %v1326_v40 = vmul.f32 2.1237322e-06, %v2494_v13  ;;  %v1337_v38 = vmul.f32 3.8918573e-05, %v2494_v13  ;;  %vm1272_vm14 = vweird.f32 %v1266_v10  ;;  %v1293_v20 = vadd.f32 0.18741608, %v1292_v61 }
 0x493   :  { %v1415_v23 = vmul.f32 %v1407_v28, %v1071_v39  ;;  %v1268_v56 = vmul.f32 %v1541_v0, %v1266_v10  ;;  %v1305_v52 = vmul.f32 %v1304_v41, %v2454_v36  ;;  %v1054_v17 = vsub.f32 1.5, %v1053_v19 }
 0x494   :  { %v1327_v27 = vadd.f32 0.00028619796, %v1326_v40  ;;  %v1338_v29 = vadd.f32 0.001143296, %v1337_v38  ;;  %vm1273_vm13 = vweird.f32 %v1541_v0  ;;  %v1279_v22 = vor.u32 1.1754944e-38, %v1278_v21 }
 0x495   :  { %1423 = vst.msk [vmem:[%s2565_s5 + $0x18] sm:$0xff] %vm139_vm1, %v1415_v23  ;;  %v1269_v58 = vsub.f32 1.0, %v1268_v56  ;;  %v1306_v33 = vadd.f32 1.0, %v1305_v52  ;;  %v1055_v44 = vmul.f32 %v1539_v35, %v1054_v17  ;;  %vm1274_vm0 = vmor %vm1272_vm14, %vm1273_vm13  ;;  %v1256_v16 = vmul.f32 %v1255_v45, %v2387_v62 }
 0x496   :  { %v1328_v31 = vmul.f32 %v1327_v27, %v2494_v13  ;;  %v1339_v11 = vmul.f32 %v1338_v29, %v2494_v13  ;;  %vm1277_vm2 = vcmp.eq.f32.partialorder %v1276_v51, 8.507059e+37  ;;  %v1294_v14 = vmul.f32 %v1293_v20, %v2454_v36 }
 0x497   :  { %v1270_v3 = vmul.f32 %v1541_v0, %v1269_v58  ;;  %1542 = vrcp.f32 %v1306_v33  ;;  %v1059_v32 = vsel %vm1058_vm15, %v1539_v35, %v1055_v44  ;;  %v1072_v48 = vmul.f32 0.5, %v2376_v8 }
 0x498   :  { %v1329_v26 = vadd.f32 0.0036580483, %v1328_v31  ;;  %v1340_v18 = vadd.f32 0.014752088, %v1339_v11  ;;  %v2510_v1 = vmul.f32 %v1059_v32, %v2232_v55  ;;  %v1295_v7 = vadd.f32 1.1283791, %v1294_v14 }
 0x499   :  { %v1271_v47 = vadd.f32 %v1541_v0, %v1270_v3  ;;  %v1318_v15 = vand.u32 2147483648, %v1306_v33  ;;  %v1316_v37 = vand.u32 2147483647, %v1306_v33  ;;  %vm1312_vm4 = vweird.f32 %v1306_v33 }
 0x49a   :  { %v1341_v6 = vmul.f32 %v1340_v18, %v2494_v13  ;;  %v2516_v53 = vmul.f32 0.70710677, %v2510_v1  ;;  %v1330_v49 = vmul.f32 %v1329_v26, %v2494_v13  ;;  %v1296_v23 = vmul.f32 %v1295_v7, %v2432_v2 }
 0x49b   :  { %v1275_v25 = vsel %vm1274_vm0, %v1541_v0, %v1271_v47  ;;  %v1319_v0 = vor.u32 1.1754944e-38, %v1318_v15  ;;  %vm1317_vm6 = vcmp.eq.f32.partialorder %v1316_v37, 8.507059e+37 }
 0x49c   :  { %v1280_v30 = vsel %vm1277_vm2, %v1279_v22, %v1275_v25  ;;  %v1342_v10 = vadd.f32 0.112945676, %v1341_v6  ;;  %v1364_v55 = vmul.f32 %v2516_v53, %v2516_v53  ;;  %v1331_v4 = vadd.f32 0.05243302, %v1330_v49 }
 0x49d   :  { %v1281_v42 = vmul.f32 %v1280_v30, %v1256_v16  ;;  %v1543_v50 = vpop.eup %1542 }
 0x49e   :  { %v1308_v62 = vmul.f32 %v1543_v50, %v1306_v33  ;;  %v1343_v9 = vmul.f32 %v1342_v10, %v2494_v13  ;;  %v2523_v59 = vmin.f32 %v1364_v55, 16.0  ;;  %vm1313_vm3 = vweird.f32 %v1543_v50 }
 0x49f   :  { %v1487_v35 = vclamps-f32 %v1281_v42, 1.0  ;;  %vm1314_vm5 = vmor %vm1312_vm4, %vm1313_vm3  ;;  %v1332_v40 = vmul.f32 %v1331_v4, %v2494_v13  ;;  %v1073_v33 = vmul.f32 0.5, %v2417_v34 }
 0x4a0   :  { %v1309_v63 = vsub.f32 1.0, %v1308_v62  ;;  %v1344_v60 = vadd.f32 0.4994258, %v1343_v9  ;;  %v1366_v46 = vmul.f32 2.1237322e-06, %v2523_v59  ;;  %v1074_v62 = vmul.f32 0.5, %v2478_v43 }
 0x4a1   :  { %v1408_v36 = vadd.f32 1.0, %v1487_v35  ;;  %v1377_v12 = vmul.f32 3.8918573e-05, %v2523_v59  ;;  %v1333_v29 = vadd.f32 0.18741608, %v1332_v40 }
 0x4a2   :  { %v1310_v5 = vmul.f32 %v1543_v50, %v1309_v63  ;;  %v1345_v8 = vmul.f32 %v1344_v60, %v2494_v13  ;;  %v1367_v39 = vadd.f32 0.00028619796, %v1366_v46 }
 0x4a3   :  { %v1416_v57 = vmul.f32 %v1408_v36, %v1072_v48  ;;  %v1378_v28 = vadd.f32 0.001143296, %v1377_v12  ;;  %v1334_v2 = vmul.f32 %v1333_v29, %v2494_v13 }
 0x4a4   :  { %v1311_v41 = vadd.f32 %v1543_v50, %v1310_v5  ;;  %v1346_v38 = vadd.f32 1.0, %v1345_v8  ;;  %v1368_v56 = vmul.f32 %v1367_v39, %v2523_v59  ;;  %v1075_v39 = vmul.f32 0.5, %v2510_v1 }
 0x4a5   :  { %1424 = vst.msk [vmem:[%s2565_s5 + $0x20] sm:$0xff] %vm139_vm1, %v1416_v57  ;;  %v1379_v19 = vmul.f32 %v1378_v28, %v2523_v59  ;;  %v1335_v26 = vadd.f32 1.1283791, %v1334_v2 }
 0x4a6   :  { %v1315_v24 = vsel %vm1314_vm5, %v1543_v50, %v1311_v41  ;;  %1544 = vrcp.f32 %v1346_v38  ;;  %v1369_v58 = vadd.f32 0.0036580483, %v1368_v56  ;;  %v1358_v18 = vand.u32 2147483648, %v1346_v38 }
 0x4a7   :  { %v1320_v61 = vsel %vm1317_vm6, %v1319_v0, %v1315_v24  ;;  %v1380_v27 = vadd.f32 0.014752088, %v1379_v19  ;;  %v1356_v22 = vand.u32 2147483647, %v1346_v38  ;;  %vm1352_vm8 = vweird.f32 %v1346_v38 }
 0x4a8   :  { %v1321_v52 = vmul.f32 %v1320_v61, %v1296_v23  ;;  %v1370_v51 = vmul.f32 %v1369_v58, %v2523_v59  ;;  %v1359_v6 = vor.u32 1.1754944e-38, %v1358_v18  ;;  %v1336_v14 = vmul.f32 %v1335_v26, %v2488_v54 }
 0x4a9   :  { %v1381_v21 = vmul.f32 %v1380_v27, %v2523_v59  ;;  %vm1357_vm10 = vcmp.eq.f32.partialorder %v1356_v22, 8.507059e+37 }
 0x4aa   :  { %v1488_v17 = vclamps-f32 %v1321_v52, 1.0  ;;  %v1371_v16 = vadd.f32 0.05243302, %v1370_v51 }
 0x4ab   :  { %v1382_v11 = vadd.f32 0.112945676, %v1381_v21 }
 0x4ac   :  { %v1409_v31 = vadd.f32 1.0, %v1488_v17  ;;  %v1545_v44 = vpop.eup %1544  ;;  %v1372_v49 = vmul.f32 %v1371_v16, %v2523_v59 }
 0x4ad   :  { %v1348_v3 = vmul.f32 %v1545_v44, %v1346_v38  ;;  %v1383_v20 = vmul.f32 %v1382_v11, %v2523_v59  ;;  %vm1353_vm7 = vweird.f32 %v1545_v44 }
 0x4ae   :  { %v1417_v45 = vmul.f32 %v1409_v31, %v1073_v33  ;;  %vm1354_vm9 = vmor %vm1352_vm8, %vm1353_vm7  ;;  %v1373_v35 = vadd.f32 0.18741608, %v1372_v49 }
 0x4af   :  { %v1349_v47 = vsub.f32 1.0, %v1348_v3  ;;  %v1384_v34 = vadd.f32 0.4994258, %v1383_v20 }
 0x4b0   :  { %1425 = vst.msk [vmem:[%s2565_s5 + $0x28] sm:$0xff] %vm139_vm1, %v1417_v45  ;;  %v1374_v36 = vmul.f32 %v1373_v35, %v2523_v59 }
 0x4b1   :  { %v1350_v32 = vmul.f32 %v1545_v44, %v1349_v47  ;;  %v1385_v13 = vmul.f32 %v1384_v34, %v2523_v59 }
 0x4b2   :  { %v1375_v4 = vadd.f32 1.1283791, %v1374_v36 }
 0x4b3   :  { %v1351_v25 = vadd.f32 %v1545_v44, %v1350_v32  ;;  %v1386_v30 = vadd.f32 1.0, %v1385_v13 }
 0x4b4   :  { %v1376_v57 = vmul.f32 %v1375_v4, %v2516_v53 }
 0x4b5   :  { %v1355_v42 = vsel %vm1354_vm9, %v1545_v44, %v1351_v25  ;;  %1546 = vrcp.f32 %v1386_v30  ;;  %v1398_v15 = vand.u32 2147483648, %v1386_v30  ;;  %v1396_v46 = vand.u32 2147483647, %v1386_v30 }
 0x4b6   :  { %v1360_v10 = vsel %vm1357_vm10, %v1359_v6, %v1355_v42  ;;  %vm1392_vm12 = vweird.f32 %v1386_v30 }
 0x4b7   :  { %v1361_v50 = vmul.f32 %v1360_v10, %v1336_v14  ;;  %v1399_v43 = vor.u32 1.1754944e-38, %v1398_v15  ;;  %vm1397_vm14 = vcmp.eq.f32.partialorder %v1396_v46, 8.507059e+37 }
 0x4b9   :  { %v1489_v55 = vclamps-f32 %v1361_v50, 1.0 }
 0x4bb   :  { %v1410_v48 = vadd.f32 1.0, %v1489_v55  ;;  %v1547_v7 = vpop.eup %1546 }
 0x4bc   :  { %v1388_v63 = vmul.f32 %v1547_v7, %v1386_v30  ;;  %vm1393_vm11 = vweird.f32 %v1547_v7 }
 0x4bd   :  { %v1418_v9 = vmul.f32 %v1410_v48, %v1074_v62  ;;  %vm1394_vm13 = vmor %vm1392_vm12, %vm1393_vm11 }
 0x4be   :  { %v1389_v54 = vsub.f32 1.0, %v1388_v63 }
 0x4bf   :  { %1426 = vst.msk [vmem:[%s2565_s5 + $0x30] sm:$0xff] %vm139_vm1, %v1418_v9 }
 0x4c0   :  { %v1390_v60 = vmul.f32 %v1547_v7, %v1389_v54 }
 0x4c2   :  { %v1391_v12 = vadd.f32 %v1547_v7, %v1390_v60 }
 0x4c4   :  { %v1395_v5 = vsel %vm1394_vm13, %v1547_v7, %v1391_v12 }
 0x4c5   :  { %v1400_v59 = vsel %vm1397_vm14, %v1399_v43, %v1395_v5 }
 0x4c6   :  { %v1401_v37 = vmul.f32 %v1400_v59, %v1376_v57 }
 0x4c8   :  { %v1490_v8 = vclamps-f32 %v1401_v37, 1.0 }
 0x4ca   :  { %v1411_v28 = vadd.f32 1.0, %v1490_v8 }
 0x4cc   :  { %v1419_v41 = vmul.f32 %v1411_v28, %v1075_v39 }
 0x4ce   :  { %1427 = vst.msk [vmem:[%s2565_s5 + $0x38] sm:$0xff] %vm139_vm1, %v1419_v41 }
 0x4cf   :  { %1432 = vsyncpa [#allocation4], 1 }
 0x4d0   :  { %1433 = vsyncpa [#allocation5], 1 }

</bundles_post_ra>
